<compile_context>
chip_gen: v7x
topology: tpu7x:2x2x1
jax: 0.10.0
libtpu: 0.0.40
codegen_flags: <defaults>
</compile_context>

<pallas_src>
import jax
import jax.numpy as jnp
from jax.experimental import pallas as pl
from jax.experimental.pallas import tpu as pltpu  # noqa: F401  (TPU backend module)


def _make_lstm_model_kernel(num_layers, seq_len, batch, hidden, num_heads,
                            out_dim, mxu_dtype):
    """Ref order:
       x_flat(S*B, D),
       [w_ih_T(D_l,4H), w_hh_T(H,4H), b(1,4H)] * L,
       w_qkv(H,3H), b_qkv(1,3H), head_mat(H,heads), head_exp(heads,H),
       w_out(H,H), b_out(1,H), w_lin(H,O), b_lin(1,O),
       out(B,O)."""
    L, S, B, H = num_layers, seq_len, batch, hidden
    scale = 1.0 / ((H // num_heads) ** 0.5)
    f32 = jnp.float32

    def _sigmoid(x):                       # explicit form: exp + add + divide
        return 1.0 / (1.0 + jnp.exp(-x))

    def kernel(*refs):
        idx = 0
        x_ref = refs[idx]; idx += 1
        layer_refs = []
        for _ in range(L):
            layer_refs.append((refs[idx], refs[idx + 1], refs[idx + 2]))
            idx += 3
        (w_qkv_ref, b_qkv_ref, head_mat_ref, head_exp_ref,
         w_o_ref, b_o_ref, w_l_ref, b_l_ref) = refs[idx:idx + 8]
        o_ref = refs[idx + 8]

        # ---- hoisted layer-0 input projection (off the serial path) ----
        w_ih0 = layer_refs[0][0][...]                       # (D, 4H)
        b0 = layer_refs[0][2][...]                          # (1, 4H) f32
        xW0 = jnp.dot(x_ref[...], w_ih0,
                      preferred_element_type=f32) + b0      # (S*B, 4H)

        # load recurrent weights once
        w_hh = [layer_refs[l][1][...] for l in range(L)]     # (H, 4H), mxu_dtype
        w_ih = [None] + [layer_refs[l][0][...] for l in range(1, L)]
        bias = [None] + [layer_refs[l][2][...] for l in range(1, L)]

        h = [jnp.zeros((B, H), f32) for _ in range(L)]
        c = [jnp.zeros((B, H), f32) for _ in range(L)]
        prev_out = [None] * L
        last_outs = []                                       # layer L-1 outputs, in time order

        def lstm_cell(g, c_prev):                            # PyTorch gate order i,f,g,o
            i_g = _sigmoid(g[:, 0:H])
            f_g = _sigmoid(g[:, H:2 * H])
            g_g = jnp.tanh(g[:, 2 * H:3 * H])
            o_g = _sigmoid(g[:, 3 * H:4 * H])
            c_new = f_g * c_prev + i_g * g_g
            h_new = o_g * jnp.tanh(c_new)
            return h_new, c_new

        # ---- wavefront over time: layer l handles t = w - l (fully unrolled) ----
        for w in range(S + L - 1):
            new_out = list(prev_out)
            for l in range(L):
                t = w - l
                if not (0 <= t < S):
                    continue
                if l == 0:
                    g = xW0[t * B:(t + 1) * B, :] + jnp.dot(
                        h[0].astype(mxu_dtype), w_hh[0],
                        preferred_element_type=f32)
                else:
                    x_in = prev_out[l - 1]                   # lower layer, same t (prev wavefront step)
                    g = (jnp.dot(x_in.astype(mxu_dtype), w_ih[l],
                                 preferred_element_type=f32)
                         + jnp.dot(h[l].astype(mxu_dtype), w_hh[l],
                                   preferred_element_type=f32)
                         + bias[l])
                h[l], c[l] = lstm_cell(g, c[l])
                new_out[l] = h[l]
                if l == L - 1:
                    last_outs.append(h[l])
            prev_out = new_out

        # ---- batched multi-head self-attention (last query row only) ----
        y_flat = jnp.concatenate(last_outs, axis=0)          # (S*B, H), row = t*B + b
        qkv = jnp.dot(y_flat, w_qkv_ref[...],
                      preferred_element_type=f32) + b_qkv_ref[...]   # (S*B, 3H)
        qkv3 = qkv.reshape(S, B, 3 * H)
        q_last = qkv3[S - 1, :, 0:H] * scale                 # (B, H)
        k = qkv3[:, :, H:2 * H]                              # (S, B, H)
        v = qkv3[:, :, 2 * H:3 * H]                          # (S, B, H)

        prod = k * q_last[None, :, :]                        # (S, B, H)
        scores = jnp.dot(prod.reshape(S * B, H), head_mat_ref[...],
                         preferred_element_type=f32).reshape(S, B, num_heads)
        m = jnp.max(scores, axis=0, keepdims=True)
        p = jnp.exp(scores - m)
        denom = jnp.sum(p, axis=0, keepdims=True)
        a = p * pl.reciprocal(denom, approx=True)            # EUP reciprocal
        a_full = jnp.dot(a.reshape(S * B, num_heads), head_exp_ref[...],
                         preferred_element_type=f32).reshape(S, B, H)
        attn = jnp.sum(a_full * v, axis=0)                   # (B, H)
        attn = jnp.dot(attn, w_o_ref[...],
                       preferred_element_type=f32) + b_o_ref[...]
        yhat = jnp.dot(attn, w_l_ref[...],
                       preferred_element_type=f32) + b_l_ref[...]
        o_ref[...] = yhat.astype(o_ref.dtype)                # single store

    return kernel


def prepare_params(params, *, num_heads, mxu_dtype=jnp.float32):
    """One-time weight prep (transposes, bias folds, head matrices, dtype casts).
    Do this once and reuse; it is intentionally outside the per-call path."""
    lstm = params["lstm"]
    H = lstm[0][1].shape[1]                 # w_hh: (4H, H)
    hd = H // num_heads
    f32 = jnp.float32

    args = []
    for (w_ih, w_hh, b_ih, b_hh) in lstm:
        args += [w_ih.T.astype(mxu_dtype),                 # (D_l, 4H)
                 w_hh.T.astype(mxu_dtype),                 # (H, 4H)
                 (b_ih + b_hh).reshape(1, -1).astype(f32)]  # (1, 4H)

    head_ids = jnp.arange(H) // hd
    head_mat = (head_ids[:, None] == jnp.arange(num_heads)[None, :]).astype(f32)  # (H, heads)

    args += [
        params["in_proj_w"].T.astype(f32),                 # (H, 3H)
        params["in_proj_b"].reshape(1, -1).astype(f32),    # (1, 3H)
        head_mat,                                          # (H, heads)
        head_mat.T,                                        # (heads, H)
        params["out_proj_w"].T.astype(f32),                # (H, H)
        params["out_proj_b"].reshape(1, -1).astype(f32),   # (1, H)
        params["lin_w"].T.astype(f32),                     # (H, O)
        params["lin_b"].reshape(1, -1).astype(f32),        # (1, O)
    ]
    return dict(args=tuple(args), num_layers=len(lstm), hidden=H,
                num_heads=num_heads, out_dim=params["lin_w"].shape[0],
                mxu_dtype=mxu_dtype)


def lstm_model_forward(x, prep):
    """x: (B, S, input_size) f32; prep from prepare_params(). -> (B, output_size)."""
    B, S, D = x.shape
    H, O, L = prep["hidden"], prep["out_dim"], prep["num_layers"]
    mxu_dtype = prep["mxu_dtype"]

    # time-major, flattened (row = t*B + b) so the kernel never reshapes the input
    x_flat = jnp.transpose(x, (1, 0, 2)).reshape(S * B, D).astype(mxu_dtype)

    kernel = _make_lstm_model_kernel(L, S, B, H, prep["num_heads"], O, mxu_dtype)
    return pl.pallas_call(
        kernel,
        out_shape=jax.ShapeDtypeStruct((B, O), jnp.float32),
    )(x_flat, *prep["args"])


def _reference(x, params, num_heads):
    """Pure-JAX reference mirroring the PyTorch forward (eval mode) exactly."""
    B, S, _ = x.shape
    y = x
    for (w_ih, w_hh, b_ih, b_hh) in params["lstm"]:
        H = w_hh.shape[1]
        h = jnp.zeros((B, H), jnp.float32)
        c = jnp.zeros((B, H), jnp.float32)
        outs = []
        for t in range(S):
            g = y[:, t, :] @ w_ih.T + h @ w_hh.T + b_ih + b_hh
            i = jax.nn.sigmoid(g[:, :H])
            f = jax.nn.sigmoid(g[:, H:2 * H])
            gg = jnp.tanh(g[:, 2 * H:3 * H])
            o = jax.nn.sigmoid(g[:, 3 * H:])
            c = f * c + i * gg
            h = o * jnp.tanh(c)
            outs.append(h)
        y = jnp.stack(outs, axis=1)
    E = y.shape[-1]
    hd = E // num_heads
    w_in, b_in = params["in_proj_w"], params["in_proj_b"]
    q = y @ w_in[:E].T + b_in[:E]
    k = y @ w_in[E:2 * E].T + b_in[E:2 * E]
    v = y @ w_in[2 * E:].T + b_in[2 * E:]
    split = lambda t: t.reshape(B, S, num_heads, hd).transpose(0, 2, 1, 3)
    qh, kh, vh = split(q), split(k), split(v)
    scores = jnp.einsum('bhqd,bhkd->bhqk', qh, kh) / jnp.sqrt(jnp.float32(hd))
    attn = jax.nn.softmax(scores, axis=-1)
    o = jnp.einsum('bhqk,bhkd->bhqd', attn, vh).transpose(0, 2, 1, 3).reshape(B, S, E)
    o = o @ params["out_proj_w"].T + params["out_proj_b"]
    last = o[:, -1, :]
    return last @ params["lin_w"].T + params["lin_b"]


if __name__ == "__main__":
    # LSTMSettings: input_size=16, hidden_size=32, num_layers=2, output_size=4,
    #               attention=True, attention_heads=4, batch_first=True
    INPUT, HIDDEN, LAYERS, OUT, HEADS = 16, 32, 2, 4, 4
    B, S = 2, 8

    key = jax.random.PRNGKey(0)
    kit = iter(jax.random.split(key, 32))

    def rnd(shape, scale=1.0):
        return jax.random.normal(next(kit), shape, jnp.float32) * scale

    sc = 1.0 / (HIDDEN ** 0.5)
    lstm_params = []
    for l in range(LAYERS):
        d_in = INPUT if l == 0 else HIDDEN
        lstm_params.append((rnd((4 * HIDDEN, d_in), sc),    # weight_ih_l{l}
                            rnd((4 * HIDDEN, HIDDEN), sc),  # weight_hh_l{l}
                            rnd((4 * HIDDEN,), sc),         # bias_ih_l{l}
                            rnd((4 * HIDDEN,), sc)))        # bias_hh_l{l}
    params = dict(
        lstm=lstm_params,
        in_proj_w=rnd((3 * HIDDEN, HIDDEN), sc),
        in_proj_b=rnd((3 * HIDDEN,), sc),
        out_proj_w=rnd((HIDDEN, HIDDEN), sc),
        out_proj_b=rnd((HIDDEN,), sc),
        lin_w=rnd((OUT, HIDDEN), sc),
        lin_b=rnd((OUT,), sc),
    )
    x = rnd((B, S, INPUT), 1.0)

    ref = _reference(x, params, HEADS)

    # f32 MXU path (all generations; tight tolerance -- only the approx EUP
    # reciprocal in the softmax perturbs numerics).
    prep_f32 = prepare_params(params, num_heads=HEADS, mxu_dtype=jnp.float32)
    fwd_f32 = jax.jit(lambda v: lstm_model_forward(v, prep_f32))
    out = jax.block_until_ready(fwd_f32(x))
    assert out.shape == (B, OUT)
    assert jnp.allclose(out, ref, atol=2e-3, rtol=2e-3), (out, ref)

    # bf16-MXU path (recommended for v6e/v7x per perf review: bf16 operands,
    # f32 accumulation); looser tolerance for the bf16 operand rounding.
    prep_bf16 = prepare_params(params, num_heads=HEADS, mxu_dtype=jnp.bfloat16)
    fwd_bf16 = jax.jit(lambda v: lstm_model_forward(v, prep_bf16))
    out_bf = jax.block_until_ready(fwd_bf16(x))
    assert out_bf.shape == (B, OUT)
    assert jnp.allclose(out_bf, ref, atol=5e-2, rtol=5e-2), (out_bf, ref)

    print("KERNEL_OK")
</pallas_src>

<mosaic_0001>
module attributes {stable_mosaic.version = 11 : i64} {
  func.func @kernel(%arg0: memref<16x16xf32, #tpu.memory_space<vmem>>, %arg1: memref<16x128xf32, #tpu.memory_space<vmem>>, %arg2: memref<32x128xf32, #tpu.memory_space<vmem>>, %arg3: memref<1x128xf32, #tpu.memory_space<vmem>>, %arg4: memref<32x128xf32, #tpu.memory_space<vmem>>, %arg5: memref<32x128xf32, #tpu.memory_space<vmem>>, %arg6: memref<1x128xf32, #tpu.memory_space<vmem>>, %arg7: memref<32x96xf32, #tpu.memory_space<vmem>>, %arg8: memref<1x96xf32, #tpu.memory_space<vmem>>, %arg9: memref<32x4xf32, #tpu.memory_space<vmem>>, %arg10: memref<4x32xf32, #tpu.memory_space<vmem>>, %arg11: memref<32x32xf32, #tpu.memory_space<vmem>>, %arg12: memref<1x32xf32, #tpu.memory_space<vmem>>, %arg13: memref<32x4xf32, #tpu.memory_space<vmem>>, %arg14: memref<1x4xf32, #tpu.memory_space<vmem>>, %arg15: memref<2x4xf32, #tpu.memory_space<vmem>>) attributes {dimension_semantics = [], scalar_prefetch = 0 : i64, scratch_operands = 0 : i64, tpu.core_type = #tpu.core_type<tc>} {
    %c0 = arith.constant 0 : index
    %c0_0 = arith.constant 0 : index
    %0 = vector.load %arg1[%c0, %c0_0] : memref<16x128xf32, #tpu.memory_space<vmem>>, vector<16x128xf32>
    %c0_1 = arith.constant 0 : index
    %c0_2 = arith.constant 0 : index
    %1 = vector.load %arg3[%c0_1, %c0_2] : memref<1x128xf32, #tpu.memory_space<vmem>>, vector<1x128xf32>
    %c0_3 = arith.constant 0 : index
    %c0_4 = arith.constant 0 : index
    %2 = vector.load %arg0[%c0_3, %c0_4] : memref<16x16xf32, #tpu.memory_space<vmem>>, vector<16x16xf32>
    %cst = arith.constant dense<0.000000e+00> : vector<16x128xf32>
    %3 = tpu.matmul %2, %0, %cst {dimension_numbers = #tpu.dot_dimension_numbers<[1], [0], [0], [1], [0, 0, 1, 1], [], []>} : vector<16x16xf32>, vector<16x128xf32>, vector<16x128xf32> -> vector<16x128xf32>
    %4 = vector.broadcast %1 : vector<1x128xf32> to vector<16x128xf32>
    %5 = arith.addf %3, %4 : vector<16x128xf32>
    %c0_5 = arith.constant 0 : index
    %c0_6 = arith.constant 0 : index
    %6 = vector.load %arg2[%c0_5, %c0_6] : memref<32x128xf32, #tpu.memory_space<vmem>>, vector<32x128xf32>
    %c0_7 = arith.constant 0 : index
    %c0_8 = arith.constant 0 : index
    %7 = vector.load %arg5[%c0_7, %c0_8] : memref<32x128xf32, #tpu.memory_space<vmem>>, vector<32x128xf32>
    %c0_9 = arith.constant 0 : index
    %c0_10 = arith.constant 0 : index
    %8 = vector.load %arg4[%c0_9, %c0_10] : memref<32x128xf32, #tpu.memory_space<vmem>>, vector<32x128xf32>
    %c0_11 = arith.constant 0 : index
    %c0_12 = arith.constant 0 : index
    %9 = vector.load %arg6[%c0_11, %c0_12] : memref<1x128xf32, #tpu.memory_space<vmem>>, vector<1x128xf32>
    %cst_13 = arith.constant 0.000000e+00 : f32
    %10 = vector.broadcast %cst_13 : f32 to vector<2x32xf32>
    %cst_14 = arith.constant 0.000000e+00 : f32
    %11 = vector.broadcast %cst_14 : f32 to vector<2x32xf32>
    %cst_15 = arith.constant 0.000000e+00 : f32
    %12 = vector.broadcast %cst_15 : f32 to vector<2x32xf32>
    %cst_16 = arith.constant 0.000000e+00 : f32
    %13 = vector.broadcast %cst_16 : f32 to vector<2x32xf32>
    %14 = vector.extract_strided_slice %5 {offsets = [0, 0], sizes = [2, 128], strides = [1, 1]} : vector<16x128xf32> to vector<2x128xf32>
    %cst_17 = arith.constant dense<0.000000e+00> : vector<2x128xf32>
    %15 = tpu.matmul %10, %6, %cst_17 {dimension_numbers = #tpu.dot_dimension_numbers<[1], [0], [0], [1], [0, 0, 1, 1], [], []>} : vector<2x32xf32>, vector<32x128xf32>, vector<2x128xf32> -> vector<2x128xf32>
    %16 = arith.addf %14, %15 : vector<2x128xf32>
    %17 = vector.extract_strided_slice %16 {offsets = [0, 0], sizes = [2, 32], strides = [1, 1]} : vector<2x128xf32> to vector<2x32xf32>
    %cst_18 = arith.constant 0.000000e+00 : f32
    %18 = vector.broadcast %cst_18 : f32 to vector<2x32xf32>
    %19 = arith.subf %18, %17 : vector<2x32xf32>
    %20 = math.exp %19 : vector<2x32xf32>
    %cst_19 = arith.constant 1.000000e+00 : f32
    %21 = vector.broadcast %cst_19 : f32 to vector<2x32xf32>
    %22 = arith.addf %21, %20 : vector<2x32xf32>
    %cst_20 = arith.constant 1.000000e+00 : f32
    %23 = vector.broadcast %cst_20 : f32 to vector<2x32xf32>
    %24 = arith.divf %23, %22 : vector<2x32xf32>
    %25 = vector.extract_strided_slice %16 {offsets = [0, 32], sizes = [2, 32], strides = [1, 1]} : vector<2x128xf32> to vector<2x32xf32>
    %cst_21 = arith.constant 0.000000e+00 : f32
    %26 = vector.broadcast %cst_21 : f32 to vector<2x32xf32>
    %27 = arith.subf %26, %25 : vector<2x32xf32>
    %28 = math.exp %27 : vector<2x32xf32>
    %cst_22 = arith.constant 1.000000e+00 : f32
    %29 = vector.broadcast %cst_22 : f32 to vector<2x32xf32>
    %30 = arith.addf %29, %28 : vector<2x32xf32>
    %cst_23 = arith.constant 1.000000e+00 : f32
    %31 = vector.broadcast %cst_23 : f32 to vector<2x32xf32>
    %32 = arith.divf %31, %30 : vector<2x32xf32>
    %33 = vector.extract_strided_slice %16 {offsets = [0, 64], sizes = [2, 32], strides = [1, 1]} : vector<2x128xf32> to vector<2x32xf32>
    %34 = math.tanh %33 : vector<2x32xf32>
    %35 = vector.extract_strided_slice %16 {offsets = [0, 96], sizes = [2, 32], strides = [1, 1]} : vector<2x128xf32> to vector<2x32xf32>
    %cst_24 = arith.constant 0.000000e+00 : f32
    %36 = vector.broadcast %cst_24 : f32 to vector<2x32xf32>
    %37 = arith.subf %36, %35 : vector<2x32xf32>
    %38 = math.exp %37 : vector<2x32xf32>
    %cst_25 = arith.constant 1.000000e+00 : f32
    %39 = vector.broadcast %cst_25 : f32 to vector<2x32xf32>
    %40 = arith.addf %39, %38 : vector<2x32xf32>
    %cst_26 = arith.constant 1.000000e+00 : f32
    %41 = vector.broadcast %cst_26 : f32 to vector<2x32xf32>
    %42 = arith.divf %41, %40 : vector<2x32xf32>
    %43 = arith.mulf %32, %12 : vector<2x32xf32>
    %44 = arith.mulf %24, %34 : vector<2x32xf32>
    %45 = arith.addf %43, %44 : vector<2x32xf32>
    %46 = math.tanh %45 : vector<2x32xf32>
    %47 = arith.mulf %42, %46 : vector<2x32xf32>
    %48 = vector.extract_strided_slice %5 {offsets = [2, 0], sizes = [2, 128], strides = [1, 1]} : vector<16x128xf32> to vector<2x128xf32>
    %cst_27 = arith.constant dense<0.000000e+00> : vector<2x128xf32>
    %49 = tpu.matmul %47, %6, %cst_27 {dimension_numbers = #tpu.dot_dimension_numbers<[1], [0], [0], [1], [0, 0, 1, 1], [], []>} : vector<2x32xf32>, vector<32x128xf32>, vector<2x128xf32> -> vector<2x128xf32>
    %50 = arith.addf %48, %49 : vector<2x128xf32>
    %51 = vector.extract_strided_slice %50 {offsets = [0, 0], sizes = [2, 32], strides = [1, 1]} : vector<2x128xf32> to vector<2x32xf32>
    %cst_28 = arith.constant 0.000000e+00 : f32
    %52 = vector.broadcast %cst_28 : f32 to vector<2x32xf32>
    %53 = arith.subf %52, %51 : vector<2x32xf32>
    %54 = math.exp %53 : vector<2x32xf32>
    %cst_29 = arith.constant 1.000000e+00 : f32
    %55 = vector.broadcast %cst_29 : f32 to vector<2x32xf32>
    %56 = arith.addf %55, %54 : vector<2x32xf32>
    %cst_30 = arith.constant 1.000000e+00 : f32
    %57 = vector.broadcast %cst_30 : f32 to vector<2x32xf32>
    %58 = arith.divf %57, %56 : vector<2x32xf32>
    %59 = vector.extract_strided_slice %50 {offsets = [0, 32], sizes = [2, 32], strides = [1, 1]} : vector<2x128xf32> to vector<2x32xf32>
    %cst_31 = arith.constant 0.000000e+00 : f32
    %60 = vector.broadcast %cst_31 : f32 to vector<2x32xf32>
    %61 = arith.subf %60, %59 : vector<2x32xf32>
    %62 = math.exp %61 : vector<2x32xf32>
    %cst_32 = arith.constant 1.000000e+00 : f32
    %63 = vector.broadcast %cst_32 : f32 to vector<2x32xf32>
    %64 = arith.addf %63, %62 : vector<2x32xf32>
    %cst_33 = arith.constant 1.000000e+00 : f32
    %65 = vector.broadcast %cst_33 : f32 to vector<2x32xf32>
    %66 = arith.divf %65, %64 : vector<2x32xf32>
    %67 = vector.extract_strided_slice %50 {offsets = [0, 64], sizes = [2, 32], strides = [1, 1]} : vector<2x128xf32> to vector<2x32xf32>
    %68 = math.tanh %67 : vector<2x32xf32>
    %69 = vector.extract_strided_slice %50 {offsets = [0, 96], sizes = [2, 32], strides = [1, 1]} : vector<2x128xf32> to vector<2x32xf32>
    %cst_34 = arith.constant 0.000000e+00 : f32
    %70 = vector.broadcast %cst_34 : f32 to vector<2x32xf32>
    %71 = arith.subf %70, %69 : vector<2x32xf32>
    %72 = math.exp %71 : vector<2x32xf32>
    %cst_35 = arith.constant 1.000000e+00 : f32
    %73 = vector.broadcast %cst_35 : f32 to vector<2x32xf32>
    %74 = arith.addf %73, %72 : vector<2x32xf32>
    %cst_36 = arith.constant 1.000000e+00 : f32
    %75 = vector.broadcast %cst_36 : f32 to vector<2x32xf32>
    %76 = arith.divf %75, %74 : vector<2x32xf32>
    %77 = arith.mulf %66, %45 : vector<2x32xf32>
    %78 = arith.mulf %58, %68 : vector<2x32xf32>
    %79 = arith.addf %77, %78 : vector<2x32xf32>
    %80 = math.tanh %79 : vector<2x32xf32>
    %81 = arith.mulf %76, %80 : vector<2x32xf32>
    %cst_37 = arith.constant dense<0.000000e+00> : vector<2x128xf32>
    %82 = tpu.matmul %47, %8, %cst_37 {dimension_numbers = #tpu.dot_dimension_numbers<[1], [0], [0], [1], [0, 0, 1, 1], [], []>} : vector<2x32xf32>, vector<32x128xf32>, vector<2x128xf32> -> vector<2x128xf32>
    %cst_38 = arith.constant dense<0.000000e+00> : vector<2x128xf32>
    %83 = tpu.matmul %11, %7, %cst_38 {dimension_numbers = #tpu.dot_dimension_numbers<[1], [0], [0], [1], [0, 0, 1, 1], [], []>} : vector<2x32xf32>, vector<32x128xf32>, vector<2x128xf32> -> vector<2x128xf32>
    %84 = arith.addf %82, %83 : vector<2x128xf32>
    %85 = vector.broadcast %9 : vector<1x128xf32> to vector<2x128xf32>
    %86 = arith.addf %84, %85 : vector<2x128xf32>
    %87 = vector.extract_strided_slice %86 {offsets = [0, 0], sizes = [2, 32], strides = [1, 1]} : vector<2x128xf32> to vector<2x32xf32>
    %cst_39 = arith.constant 0.000000e+00 : f32
    %88 = vector.broadcast %cst_39 : f32 to vector<2x32xf32>
    %89 = arith.subf %88, %87 : vector<2x32xf32>
    %90 = math.exp %89 : vector<2x32xf32>
    %cst_40 = arith.constant 1.000000e+00 : f32
    %91 = vector.broadcast %cst_40 : f32 to vector<2x32xf32>
    %92 = arith.addf %91, %90 : vector<2x32xf32>
    %cst_41 = arith.constant 1.000000e+00 : f32
    %93 = vector.broadcast %cst_41 : f32 to vector<2x32xf32>
    %94 = arith.divf %93, %92 : vector<2x32xf32>
    %95 = vector.extract_strided_slice %86 {offsets = [0, 32], sizes = [2, 32], strides = [1, 1]} : vector<2x128xf32> to vector<2x32xf32>
    %cst_42 = arith.constant 0.000000e+00 : f32
    %96 = vector.broadcast %cst_42 : f32 to vector<2x32xf32>
    %97 = arith.subf %96, %95 : vector<2x32xf32>
    %98 = math.exp %97 : vector<2x32xf32>
    %cst_43 = arith.constant 1.000000e+00 : f32
    %99 = vector.broadcast %cst_43 : f32 to vector<2x32xf32>
    %100 = arith.addf %99, %98 : vector<2x32xf32>
    %cst_44 = arith.constant 1.000000e+00 : f32
    %101 = vector.broadcast %cst_44 : f32 to vector<2x32xf32>
    %102 = arith.divf %101, %100 : vector<2x32xf32>
    %103 = vector.extract_strided_slice %86 {offsets = [0, 64], sizes = [2, 32], strides = [1, 1]} : vector<2x128xf32> to vector<2x32xf32>
    %104 = math.tanh %103 : vector<2x32xf32>
    %105 = vector.extract_strided_slice %86 {offsets = [0, 96], sizes = [2, 32], strides = [1, 1]} : vector<2x128xf32> to vector<2x32xf32>
    %cst_45 = arith.constant 0.000000e+00 : f32
    %106 = vector.broadcast %cst_45 : f32 to vector<2x32xf32>
    %107 = arith.subf %106, %105 : vector<2x32xf32>
    %108 = math.exp %107 : vector<2x32xf32>
    %cst_46 = arith.constant 1.000000e+00 : f32
    %109 = vector.broadcast %cst_46 : f32 to vector<2x32xf32>
    %110 = arith.addf %109, %108 : vector<2x32xf32>
    %cst_47 = arith.constant 1.000000e+00 : f32
    %111 = vector.broadcast %cst_47 : f32 to vector<2x32xf32>
    %112 = arith.divf %111, %110 : vector<2x32xf32>
    %113 = arith.mulf %102, %13 : vector<2x32xf32>
    %114 = arith.mulf %94, %104 : vector<2x32xf32>
    %115 = arith.addf %113, %114 : vector<2x32xf32>
    %116 = math.tanh %115 : vector<2x32xf32>
    %117 = arith.mulf %112, %116 : vector<2x32xf32>
    %118 = vector.extract_strided_slice %5 {offsets = [4, 0], sizes = [2, 128], strides = [1, 1]} : vector<16x128xf32> to vector<2x128xf32>
    %cst_48 = arith.constant dense<0.000000e+00> : vector<2x128xf32>
    %119 = tpu.matmul %81, %6, %cst_48 {dimension_numbers = #tpu.dot_dimension_numbers<[1], [0], [0], [1], [0, 0, 1, 1], [], []>} : vector<2x32xf32>, vector<32x128xf32>, vector<2x128xf32> -> vector<2x128xf32>
    %120 = arith.addf %118, %119 : vector<2x128xf32>
    %121 = vector.extract_strided_slice %120 {offsets = [0, 0], sizes = [2, 32], strides = [1, 1]} : vector<2x128xf32> to vector<2x32xf32>
    %cst_49 = arith.constant 0.000000e+00 : f32
    %122 = vector.broadcast %cst_49 : f32 to vector<2x32xf32>
    %123 = arith.subf %122, %121 : vector<2x32xf32>
    %124 = math.exp %123 : vector<2x32xf32>
    %cst_50 = arith.constant 1.000000e+00 : f32
    %125 = vector.broadcast %cst_50 : f32 to vector<2x32xf32>
    %126 = arith.addf %125, %124 : vector<2x32xf32>
    %cst_51 = arith.constant 1.000000e+00 : f32
    %127 = vector.broadcast %cst_51 : f32 to vector<2x32xf32>
    %128 = arith.divf %127, %126 : vector<2x32xf32>
    %129 = vector.extract_strided_slice %120 {offsets = [0, 32], sizes = [2, 32], strides = [1, 1]} : vector<2x128xf32> to vector<2x32xf32>
    %cst_52 = arith.constant 0.000000e+00 : f32
    %130 = vector.broadcast %cst_52 : f32 to vector<2x32xf32>
    %131 = arith.subf %130, %129 : vector<2x32xf32>
    %132 = math.exp %131 : vector<2x32xf32>
    %cst_53 = arith.constant 1.000000e+00 : f32
    %133 = vector.broadcast %cst_53 : f32 to vector<2x32xf32>
    %134 = arith.addf %133, %132 : vector<2x32xf32>
    %cst_54 = arith.constant 1.000000e+00 : f32
    %135 = vector.broadcast %cst_54 : f32 to vector<2x32xf32>
    %136 = arith.divf %135, %134 : vector<2x32xf32>
    %137 = vector.extract_strided_slice %120 {offsets = [0, 64], sizes = [2, 32], strides = [1, 1]} : vector<2x128xf32> to vector<2x32xf32>
    %138 = math.tanh %137 : vector<2x32xf32>
    %139 = vector.extract_strided_slice %120 {offsets = [0, 96], sizes = [2, 32], strides = [1, 1]} : vector<2x128xf32> to vector<2x32xf32>
    %cst_55 = arith.constant 0.000000e+00 : f32
    %140 = vector.broadcast %cst_55 : f32 to vector<2x32xf32>
    %141 = arith.subf %140, %139 : vector<2x32xf32>
    %142 = math.exp %141 : vector<2x32xf32>
    %cst_56 = arith.constant 1.000000e+00 : f32
    %143 = vector.broadcast %cst_56 : f32 to vector<2x32xf32>
    %144 = arith.addf %143, %142 : vector<2x32xf32>
    %cst_57 = arith.constant 1.000000e+00 : f32
    %145 = vector.broadcast %cst_57 : f32 to vector<2x32xf32>
    %146 = arith.divf %145, %144 : vector<2x32xf32>
    %147 = arith.mulf %136, %79 : vector<2x32xf32>
    %148 = arith.mulf %128, %138 : vector<2x32xf32>
    %149 = arith.addf %147, %148 : vector<2x32xf32>
    %150 = math.tanh %149 : vector<2x32xf32>
    %151 = arith.mulf %146, %150 : vector<2x32xf32>
    %cst_58 = arith.constant dense<0.000000e+00> : vector<2x128xf32>
    %152 = tpu.matmul %81, %8, %cst_58 {dimension_numbers = #tpu.dot_dimension_numbers<[1], [0], [0], [1], [0, 0, 1, 1], [], []>} : vector<2x32xf32>, vector<32x128xf32>, vector<2x128xf32> -> vector<2x128xf32>
    %cst_59 = arith.constant dense<0.000000e+00> : vector<2x128xf32>
    %153 = tpu.matmul %117, %7, %cst_59 {dimension_numbers = #tpu.dot_dimension_numbers<[1], [0], [0], [1], [0, 0, 1, 1], [], []>} : vector<2x32xf32>, vector<32x128xf32>, vector<2x128xf32> -> vector<2x128xf32>
    %154 = arith.addf %152, %153 : vector<2x128xf32>
    %155 = vector.broadcast %9 : vector<1x128xf32> to vector<2x128xf32>
    %156 = arith.addf %154, %155 : vector<2x128xf32>
    %157 = vector.extract_strided_slice %156 {offsets = [0, 0], sizes = [2, 32], strides = [1, 1]} : vector<2x128xf32> to vector<2x32xf32>
    %cst_60 = arith.constant 0.000000e+00 : f32
    %158 = vector.broadcast %cst_60 : f32 to vector<2x32xf32>
    %159 = arith.subf %158, %157 : vector<2x32xf32>
    %160 = math.exp %159 : vector<2x32xf32>
    %cst_61 = arith.constant 1.000000e+00 : f32
    %161 = vector.broadcast %cst_61 : f32 to vector<2x32xf32>
    %162 = arith.addf %161, %160 : vector<2x32xf32>
    %cst_62 = arith.constant 1.000000e+00 : f32
    %163 = vector.broadcast %cst_62 : f32 to vector<2x32xf32>
    %164 = arith.divf %163, %162 : vector<2x32xf32>
    %165 = vector.extract_strided_slice %156 {offsets = [0, 32], sizes = [2, 32], strides = [1, 1]} : vector<2x128xf32> to vector<2x32xf32>
    %cst_63 = arith.constant 0.000000e+00 : f32
    %166 = vector.broadcast %cst_63 : f32 to vector<2x32xf32>
    %167 = arith.subf %166, %165 : vector<2x32xf32>
    %168 = math.exp %167 : vector<2x32xf32>
    %cst_64 = arith.constant 1.000000e+00 : f32
    %169 = vector.broadcast %cst_64 : f32 to vector<2x32xf32>
    %170 = arith.addf %169, %168 : vector<2x32xf32>
    %cst_65 = arith.constant 1.000000e+00 : f32
    %171 = vector.broadcast %cst_65 : f32 to vector<2x32xf32>
    %172 = arith.divf %171, %170 : vector<2x32xf32>
    %173 = vector.extract_strided_slice %156 {offsets = [0, 64], sizes = [2, 32], strides = [1, 1]} : vector<2x128xf32> to vector<2x32xf32>
    %174 = math.tanh %173 : vector<2x32xf32>
    %175 = vector.extract_strided_slice %156 {offsets = [0, 96], sizes = [2, 32], strides = [1, 1]} : vector<2x128xf32> to vector<2x32xf32>
    %cst_66 = arith.constant 0.000000e+00 : f32
    %176 = vector.broadcast %cst_66 : f32 to vector<2x32xf32>
    %177 = arith.subf %176, %175 : vector<2x32xf32>
    %178 = math.exp %177 : vector<2x32xf32>
    %cst_67 = arith.constant 1.000000e+00 : f32
    %179 = vector.broadcast %cst_67 : f32 to vector<2x32xf32>
    %180 = arith.addf %179, %178 : vector<2x32xf32>
    %cst_68 = arith.constant 1.000000e+00 : f32
    %181 = vector.broadcast %cst_68 : f32 to vector<2x32xf32>
    %182 = arith.divf %181, %180 : vector<2x32xf32>
    %183 = arith.mulf %172, %115 : vector<2x32xf32>
    %184 = arith.mulf %164, %174 : vector<2x32xf32>
    %185 = arith.addf %183, %184 : vector<2x32xf32>
    %186 = math.tanh %185 : vector<2x32xf32>
    %187 = arith.mulf %182, %186 : vector<2x32xf32>
    %188 = vector.extract_strided_slice %5 {offsets = [6, 0], sizes = [2, 128], strides = [1, 1]} : vector<16x128xf32> to vector<2x128xf32>
    %cst_69 = arith.constant dense<0.000000e+00> : vector<2x128xf32>
    %189 = tpu.matmul %151, %6, %cst_69 {dimension_numbers = #tpu.dot_dimension_numbers<[1], [0], [0], [1], [0, 0, 1, 1], [], []>} : vector<2x32xf32>, vector<32x128xf32>, vector<2x128xf32> -> vector<2x128xf32>
    %190 = arith.addf %188, %189 : vector<2x128xf32>
    %191 = vector.extract_strided_slice %190 {offsets = [0, 0], sizes = [2, 32], strides = [1, 1]} : vector<2x128xf32> to vector<2x32xf32>
    %cst_70 = arith.constant 0.000000e+00 : f32
    %192 = vector.broadcast %cst_70 : f32 to vector<2x32xf32>
    %193 = arith.subf %192, %191 : vector<2x32xf32>
    %194 = math.exp %193 : vector<2x32xf32>
    %cst_71 = arith.constant 1.000000e+00 : f32
    %195 = vector.broadcast %cst_71 : f32 to vector<2x32xf32>
    %196 = arith.addf %195, %194 : vector<2x32xf32>
    %cst_72 = arith.constant 1.000000e+00 : f32
    %197 = vector.broadcast %cst_72 : f32 to vector<2x32xf32>
    %198 = arith.divf %197, %196 : vector<2x32xf32>
    %199 = vector.extract_strided_slice %190 {offsets = [0, 32], sizes = [2, 32], strides = [1, 1]} : vector<2x128xf32> to vector<2x32xf32>
    %cst_73 = arith.constant 0.000000e+00 : f32
    %200 = vector.broadcast %cst_73 : f32 to vector<2x32xf32>
    %201 = arith.subf %200, %199 : vector<2x32xf32>
    %202 = math.exp %201 : vector<2x32xf32>
    %cst_74 = arith.constant 1.000000e+00 : f32
    %203 = vector.broadcast %cst_74 : f32 to vector<2x32xf32>
    %204 = arith.addf %203, %202 : vector<2x32xf32>
    %cst_75 = arith.constant 1.000000e+00 : f32
    %205 = vector.broadcast %cst_75 : f32 to vector<2x32xf32>
    %206 = arith.divf %205, %204 : vector<2x32xf32>
    %207 = vector.extract_strided_slice %190 {offsets = [0, 64], sizes = [2, 32], strides = [1, 1]} : vector<2x128xf32> to vector<2x32xf32>
    %208 = math.tanh %207 : vector<2x32xf32>
    %209 = vector.extract_strided_slice %190 {offsets = [0, 96], sizes = [2, 32], strides = [1, 1]} : vector<2x128xf32> to vector<2x32xf32>
    %cst_76 = arith.constant 0.000000e+00 : f32
    %210 = vector.broadcast %cst_76 : f32 to vector<2x32xf32>
    %211 = arith.subf %210, %209 : vector<2x32xf32>
    %212 = math.exp %211 : vector<2x32xf32>
    %cst_77 = arith.constant 1.000000e+00 : f32
    %213 = vector.broadcast %cst_77 : f32 to vector<2x32xf32>
    %214 = arith.addf %213, %212 : vector<2x32xf32>
    %cst_78 = arith.constant 1.000000e+00 : f32
    %215 = vector.broadcast %cst_78 : f32 to vector<2x32xf32>
    %216 = arith.divf %215, %214 : vector<2x32xf32>
    %217 = arith.mulf %206, %149 : vector<2x32xf32>
    %218 = arith.mulf %198, %208 : vector<2x32xf32>
    %219 = arith.addf %217, %218 : vector<2x32xf32>
    %220 = math.tanh %219 : vector<2x32xf32>
    %221 = arith.mulf %216, %220 : vector<2x32xf32>
    %cst_79 = arith.constant dense<0.000000e+00> : vector<2x128xf32>
    %222 = tpu.matmul %151, %8, %cst_79 {dimension_numbers = #tpu.dot_dimension_numbers<[1], [0], [0], [1], [0, 0, 1, 1], [], []>} : vector<2x32xf32>, vector<32x128xf32>, vector<2x128xf32> -> vector<2x128xf32>
    %cst_80 = arith.constant dense<0.000000e+00> : vector<2x128xf32>
    %223 = tpu.matmul %187, %7, %cst_80 {dimension_numbers = #tpu.dot_dimension_numbers<[1], [0], [0], [1], [0, 0, 1, 1], [], []>} : vector<2x32xf32>, vector<32x128xf32>, vector<2x128xf32> -> vector<2x128xf32>
    %224 = arith.addf %222, %223 : vector<2x128xf32>
    %225 = vector.broadcast %9 : vector<1x128xf32> to vector<2x128xf32>
    %226 = arith.addf %224, %225 : vector<2x128xf32>
    %227 = vector.extract_strided_slice %226 {offsets = [0, 0], sizes = [2, 32], strides = [1, 1]} : vector<2x128xf32> to vector<2x32xf32>
    %cst_81 = arith.constant 0.000000e+00 : f32
    %228 = vector.broadcast %cst_81 : f32 to vector<2x32xf32>
    %229 = arith.subf %228, %227 : vector<2x32xf32>
    %230 = math.exp %229 : vector<2x32xf32>
    %cst_82 = arith.constant 1.000000e+00 : f32
    %231 = vector.broadcast %cst_82 : f32 to vector<2x32xf32>
    %232 = arith.addf %231, %230 : vector<2x32xf32>
    %cst_83 = arith.constant 1.000000e+00 : f32
    %233 = vector.broadcast %cst_83 : f32 to vector<2x32xf32>
    %234 = arith.divf %233, %232 : vector<2x32xf32>
    %235 = vector.extract_strided_slice %226 {offsets = [0, 32], sizes = [2, 32], strides = [1, 1]} : vector<2x128xf32> to vector<2x32xf32>
    %cst_84 = arith.constant 0.000000e+00 : f32
    %236 = vector.broadcast %cst_84 : f32 to vector<2x32xf32>
    %237 = arith.subf %236, %235 : vector<2x32xf32>
    %238 = math.exp %237 : vector<2x32xf32>
    %cst_85 = arith.constant 1.000000e+00 : f32
    %239 = vector.broadcast %cst_85 : f32 to vector<2x32xf32>
    %240 = arith.addf %239, %238 : vector<2x32xf32>
    %cst_86 = arith.constant 1.000000e+00 : f32
    %241 = vector.broadcast %cst_86 : f32 to vector<2x32xf32>
    %242 = arith.divf %241, %240 : vector<2x32xf32>
    %243 = vector.extract_strided_slice %226 {offsets = [0, 64], sizes = [2, 32], strides = [1, 1]} : vector<2x128xf32> to vector<2x32xf32>
    %244 = math.tanh %243 : vector<2x32xf32>
    %245 = vector.extract_strided_slice %226 {offsets = [0, 96], sizes = [2, 32], strides = [1, 1]} : vector<2x128xf32> to vector<2x32xf32>
    %cst_87 = arith.constant 0.000000e+00 : f32
    %246 = vector.broadcast %cst_87 : f32 to vector<2x32xf32>
    %247 = arith.subf %246, %245 : vector<2x32xf32>
    %248 = math.exp %247 : vector<2x32xf32>
    %cst_88 = arith.constant 1.000000e+00 : f32
    %249 = vector.broadcast %cst_88 : f32 to vector<2x32xf32>
    %250 = arith.addf %249, %248 : vector<2x32xf32>
    %cst_89 = arith.constant 1.000000e+00 : f32
    %251 = vector.broadcast %cst_89 : f32 to vector<2x32xf32>
    %252 = arith.divf %251, %250 : vector<2x32xf32>
    %253 = arith.mulf %242, %185 : vector<2x32xf32>
    %254 = arith.mulf %234, %244 : vector<2x32xf32>
    %255 = arith.addf %253, %254 : vector<2x32xf32>
    %256 = math.tanh %255 : vector<2x32xf32>
    %257 = arith.mulf %252, %256 : vector<2x32xf32>
    %258 = vector.extract_strided_slice %5 {offsets = [8, 0], sizes = [2, 128], strides = [1, 1]} : vector<16x128xf32> to vector<2x128xf32>
    %cst_90 = arith.constant dense<0.000000e+00> : vector<2x128xf32>
    %259 = tpu.matmul %221, %6, %cst_90 {dimension_numbers = #tpu.dot_dimension_numbers<[1], [0], [0], [1], [0, 0, 1, 1], [], []>} : vector<2x32xf32>, vector<32x128xf32>, vector<2x128xf32> -> vector<2x128xf32>
    %260 = arith.addf %258, %259 : vector<2x128xf32>
    %261 = vector.extract_strided_slice %260 {offsets = [0, 0], sizes = [2, 32], strides = [1, 1]} : vector<2x128xf32> to vector<2x32xf32>
    %cst_91 = arith.constant 0.000000e+00 : f32
    %262 = vector.broadcast %cst_91 : f32 to vector<2x32xf32>
    %263 = arith.subf %262, %261 : vector<2x32xf32>
    %264 = math.exp %263 : vector<2x32xf32>
    %cst_92 = arith.constant 1.000000e+00 : f32
    %265 = vector.broadcast %cst_92 : f32 to vector<2x32xf32>
    %266 = arith.addf %265, %264 : vector<2x32xf32>
    %cst_93 = arith.constant 1.000000e+00 : f32
    %267 = vector.broadcast %cst_93 : f32 to vector<2x32xf32>
    %268 = arith.divf %267, %266 : vector<2x32xf32>
    %269 = vector.extract_strided_slice %260 {offsets = [0, 32], sizes = [2, 32], strides = [1, 1]} : vector<2x128xf32> to vector<2x32xf32>
    %cst_94 = arith.constant 0.000000e+00 : f32
    %270 = vector.broadcast %cst_94 : f32 to vector<2x32xf32>
    %271 = arith.subf %270, %269 : vector<2x32xf32>
    %272 = math.exp %271 : vector<2x32xf32>
    %cst_95 = arith.constant 1.000000e+00 : f32
    %273 = vector.broadcast %cst_95 : f32 to vector<2x32xf32>
    %274 = arith.addf %273, %272 : vector<2x32xf32>
    %cst_96 = arith.constant 1.000000e+00 : f32
    %275 = vector.broadcast %cst_96 : f32 to vector<2x32xf32>
    %276 = arith.divf %275, %274 : vector<2x32xf32>
    %277 = vector.extract_strided_slice %260 {offsets = [0, 64], sizes = [2, 32], strides = [1, 1]} : vector<2x128xf32> to vector<2x32xf32>
    %278 = math.tanh %277 : vector<2x32xf32>
    %279 = vector.extract_strided_slice %260 {offsets = [0, 96], sizes = [2, 32], strides = [1, 1]} : vector<2x128xf32> to vector<2x32xf32>
    %cst_97 = arith.constant 0.000000e+00 : f32
    %280 = vector.broadcast %cst_97 : f32 to vector<2x32xf32>
    %281 = arith.subf %280, %279 : vector<2x32xf32>
    %282 = math.exp %281 : vector<2x32xf32>
    %cst_98 = arith.constant 1.000000e+00 : f32
    %283 = vector.broadcast %cst_98 : f32 to vector<2x32xf32>
    %284 = arith.addf %283, %282 : vector<2x32xf32>
    %cst_99 = arith.constant 1.000000e+00 : f32
    %285 = vector.broadcast %cst_99 : f32 to vector<2x32xf32>
    %286 = arith.divf %285, %284 : vector<2x32xf32>
    %287 = arith.mulf %276, %219 : vector<2x32xf32>
    %288 = arith.mulf %268, %278 : vector<2x32xf32>
    %289 = arith.addf %287, %288 : vector<2x32xf32>
    %290 = math.tanh %289 : vector<2x32xf32>
    %291 = arith.mulf %286, %290 : vector<2x32xf32>
    %cst_100 = arith.constant dense<0.000000e+00> : vector<2x128xf32>
    %292 = tpu.matmul %221, %8, %cst_100 {dimension_numbers = #tpu.dot_dimension_numbers<[1], [0], [0], [1], [0, 0, 1, 1], [], []>} : vector<2x32xf32>, vector<32x128xf32>, vector<2x128xf32> -> vector<2x128xf32>
    %cst_101 = arith.constant dense<0.000000e+00> : vector<2x128xf32>
    %293 = tpu.matmul %257, %7, %cst_101 {dimension_numbers = #tpu.dot_dimension_numbers<[1], [0], [0], [1], [0, 0, 1, 1], [], []>} : vector<2x32xf32>, vector<32x128xf32>, vector<2x128xf32> -> vector<2x128xf32>
    %294 = arith.addf %292, %293 : vector<2x128xf32>
    %295 = vector.broadcast %9 : vector<1x128xf32> to vector<2x128xf32>
    %296 = arith.addf %294, %295 : vector<2x128xf32>
    %297 = vector.extract_strided_slice %296 {offsets = [0, 0], sizes = [2, 32], strides = [1, 1]} : vector<2x128xf32> to vector<2x32xf32>
    %cst_102 = arith.constant 0.000000e+00 : f32
    %298 = vector.broadcast %cst_102 : f32 to vector<2x32xf32>
    %299 = arith.subf %298, %297 : vector<2x32xf32>
    %300 = math.exp %299 : vector<2x32xf32>
    %cst_103 = arith.constant 1.000000e+00 : f32
    %301 = vector.broadcast %cst_103 : f32 to vector<2x32xf32>
    %302 = arith.addf %301, %300 : vector<2x32xf32>
    %cst_104 = arith.constant 1.000000e+00 : f32
    %303 = vector.broadcast %cst_104 : f32 to vector<2x32xf32>
    %304 = arith.divf %303, %302 : vector<2x32xf32>
    %305 = vector.extract_strided_slice %296 {offsets = [0, 32], sizes = [2, 32], strides = [1, 1]} : vector<2x128xf32> to vector<2x32xf32>
    %cst_105 = arith.constant 0.000000e+00 : f32
    %306 = vector.broadcast %cst_105 : f32 to vector<2x32xf32>
    %307 = arith.subf %306, %305 : vector<2x32xf32>
    %308 = math.exp %307 : vector<2x32xf32>
    %cst_106 = arith.constant 1.000000e+00 : f32
    %309 = vector.broadcast %cst_106 : f32 to vector<2x32xf32>
    %310 = arith.addf %309, %308 : vector<2x32xf32>
    %cst_107 = arith.constant 1.000000e+00 : f32
    %311 = vector.broadcast %cst_107 : f32 to vector<2x32xf32>
    %312 = arith.divf %311, %310 : vector<2x32xf32>
    %313 = vector.extract_strided_slice %296 {offsets = [0, 64], sizes = [2, 32], strides = [1, 1]} : vector<2x128xf32> to vector<2x32xf32>
    %314 = math.tanh %313 : vector<2x32xf32>
    %315 = vector.extract_strided_slice %296 {offsets = [0, 96], sizes = [2, 32], strides = [1, 1]} : vector<2x128xf32> to vector<2x32xf32>
    %cst_108 = arith.constant 0.000000e+00 : f32
    %316 = vector.broadcast %cst_108 : f32 to vector<2x32xf32>
    %317 = arith.subf %316, %315 : vector<2x32xf32>
    %318 = math.exp %317 : vector<2x32xf32>
    %cst_109 = arith.constant 1.000000e+00 : f32
    %319 = vector.broadcast %cst_109 : f32 to vector<2x32xf32>
    %320 = arith.addf %319, %318 : vector<2x32xf32>
    %cst_110 = arith.constant 1.000000e+00 : f32
    %321 = vector.broadcast %cst_110 : f32 to vector<2x32xf32>
    %322 = arith.divf %321, %320 : vector<2x32xf32>
    %323 = arith.mulf %312, %255 : vector<2x32xf32>
    %324 = arith.mulf %304, %314 : vector<2x32xf32>
    %325 = arith.addf %323, %324 : vector<2x32xf32>
    %326 = math.tanh %325 : vector<2x32xf32>
    %327 = arith.mulf %322, %326 : vector<2x32xf32>
    %328 = vector.extract_strided_slice %5 {offsets = [10, 0], sizes = [2, 128], strides = [1, 1]} : vector<16x128xf32> to vector<2x128xf32>
    %cst_111 = arith.constant dense<0.000000e+00> : vector<2x128xf32>
    %329 = tpu.matmul %291, %6, %cst_111 {dimension_numbers = #tpu.dot_dimension_numbers<[1], [0], [0], [1], [0, 0, 1, 1], [], []>} : vector<2x32xf32>, vector<32x128xf32>, vector<2x128xf32> -> vector<2x128xf32>
    %330 = arith.addf %328, %329 : vector<2x128xf32>
    %331 = vector.extract_strided_slice %330 {offsets = [0, 0], sizes = [2, 32], strides = [1, 1]} : vector<2x128xf32> to vector<2x32xf32>
    %cst_112 = arith.constant 0.000000e+00 : f32
    %332 = vector.broadcast %cst_112 : f32 to vector<2x32xf32>
    %333 = arith.subf %332, %331 : vector<2x32xf32>
    %334 = math.exp %333 : vector<2x32xf32>
    %cst_113 = arith.constant 1.000000e+00 : f32
    %335 = vector.broadcast %cst_113 : f32 to vector<2x32xf32>
    %336 = arith.addf %335, %334 : vector<2x32xf32>
    %cst_114 = arith.constant 1.000000e+00 : f32
    %337 = vector.broadcast %cst_114 : f32 to vector<2x32xf32>
    %338 = arith.divf %337, %336 : vector<2x32xf32>
    %339 = vector.extract_strided_slice %330 {offsets = [0, 32], sizes = [2, 32], strides = [1, 1]} : vector<2x128xf32> to vector<2x32xf32>
    %cst_115 = arith.constant 0.000000e+00 : f32
    %340 = vector.broadcast %cst_115 : f32 to vector<2x32xf32>
    %341 = arith.subf %340, %339 : vector<2x32xf32>
    %342 = math.exp %341 : vector<2x32xf32>
    %cst_116 = arith.constant 1.000000e+00 : f32
    %343 = vector.broadcast %cst_116 : f32 to vector<2x32xf32>
    %344 = arith.addf %343, %342 : vector<2x32xf32>
    %cst_117 = arith.constant 1.000000e+00 : f32
    %345 = vector.broadcast %cst_117 : f32 to vector<2x32xf32>
    %346 = arith.divf %345, %344 : vector<2x32xf32>
    %347 = vector.extract_strided_slice %330 {offsets = [0, 64], sizes = [2, 32], strides = [1, 1]} : vector<2x128xf32> to vector<2x32xf32>
    %348 = math.tanh %347 : vector<2x32xf32>
    %349 = vector.extract_strided_slice %330 {offsets = [0, 96], sizes = [2, 32], strides = [1, 1]} : vector<2x128xf32> to vector<2x32xf32>
    %cst_118 = arith.constant 0.000000e+00 : f32
    %350 = vector.broadcast %cst_118 : f32 to vector<2x32xf32>
    %351 = arith.subf %350, %349 : vector<2x32xf32>
    %352 = math.exp %351 : vector<2x32xf32>
    %cst_119 = arith.constant 1.000000e+00 : f32
    %353 = vector.broadcast %cst_119 : f32 to vector<2x32xf32>
    %354 = arith.addf %353, %352 : vector<2x32xf32>
    %cst_120 = arith.constant 1.000000e+00 : f32
    %355 = vector.broadcast %cst_120 : f32 to vector<2x32xf32>
    %356 = arith.divf %355, %354 : vector<2x32xf32>
    %357 = arith.mulf %346, %289 : vector<2x32xf32>
    %358 = arith.mulf %338, %348 : vector<2x32xf32>
    %359 = arith.addf %357, %358 : vector<2x32xf32>
    %360 = math.tanh %359 : vector<2x32xf32>
    %361 = arith.mulf %356, %360 : vector<2x32xf32>
    %cst_121 = arith.constant dense<0.000000e+00> : vector<2x128xf32>
    %362 = tpu.matmul %291, %8, %cst_121 {dimension_numbers = #tpu.dot_dimension_numbers<[1], [0], [0], [1], [0, 0, 1, 1], [], []>} : vector<2x32xf32>, vector<32x128xf32>, vector<2x128xf32> -> vector<2x128xf32>
    %cst_122 = arith.constant dense<0.000000e+00> : vector<2x128xf32>
    %363 = tpu.matmul %327, %7, %cst_122 {dimension_numbers = #tpu.dot_dimension_numbers<[1], [0], [0], [1], [0, 0, 1, 1], [], []>} : vector<2x32xf32>, vector<32x128xf32>, vector<2x128xf32> -> vector<2x128xf32>
    %364 = arith.addf %362, %363 : vector<2x128xf32>
    %365 = vector.broadcast %9 : vector<1x128xf32> to vector<2x128xf32>
    %366 = arith.addf %364, %365 : vector<2x128xf32>
    %367 = vector.extract_strided_slice %366 {offsets = [0, 0], sizes = [2, 32], strides = [1, 1]} : vector<2x128xf32> to vector<2x32xf32>
    %cst_123 = arith.constant 0.000000e+00 : f32
    %368 = vector.broadcast %cst_123 : f32 to vector<2x32xf32>
    %369 = arith.subf %368, %367 : vector<2x32xf32>
    %370 = math.exp %369 : vector<2x32xf32>
    %cst_124 = arith.constant 1.000000e+00 : f32
    %371 = vector.broadcast %cst_124 : f32 to vector<2x32xf32>
    %372 = arith.addf %371, %370 : vector<2x32xf32>
    %cst_125 = arith.constant 1.000000e+00 : f32
    %373 = vector.broadcast %cst_125 : f32 to vector<2x32xf32>
    %374 = arith.divf %373, %372 : vector<2x32xf32>
    %375 = vector.extract_strided_slice %366 {offsets = [0, 32], sizes = [2, 32], strides = [1, 1]} : vector<2x128xf32> to vector<2x32xf32>
    %cst_126 = arith.constant 0.000000e+00 : f32
    %376 = vector.broadcast %cst_126 : f32 to vector<2x32xf32>
    %377 = arith.subf %376, %375 : vector<2x32xf32>
    %378 = math.exp %377 : vector<2x32xf32>
    %cst_127 = arith.constant 1.000000e+00 : f32
    %379 = vector.broadcast %cst_127 : f32 to vector<2x32xf32>
    %380 = arith.addf %379, %378 : vector<2x32xf32>
    %cst_128 = arith.constant 1.000000e+00 : f32
    %381 = vector.broadcast %cst_128 : f32 to vector<2x32xf32>
    %382 = arith.divf %381, %380 : vector<2x32xf32>
    %383 = vector.extract_strided_slice %366 {offsets = [0, 64], sizes = [2, 32], strides = [1, 1]} : vector<2x128xf32> to vector<2x32xf32>
    %384 = math.tanh %383 : vector<2x32xf32>
    %385 = vector.extract_strided_slice %366 {offsets = [0, 96], sizes = [2, 32], strides = [1, 1]} : vector<2x128xf32> to vector<2x32xf32>
    %cst_129 = arith.constant 0.000000e+00 : f32
    %386 = vector.broadcast %cst_129 : f32 to vector<2x32xf32>
    %387 = arith.subf %386, %385 : vector<2x32xf32>
    %388 = math.exp %387 : vector<2x32xf32>
    %cst_130 = arith.constant 1.000000e+00 : f32
    %389 = vector.broadcast %cst_130 : f32 to vector<2x32xf32>
    %390 = arith.addf %389, %388 : vector<2x32xf32>
    %cst_131 = arith.constant 1.000000e+00 : f32
    %391 = vector.broadcast %cst_131 : f32 to vector<2x32xf32>
    %392 = arith.divf %391, %390 : vector<2x32xf32>
    %393 = arith.mulf %382, %325 : vector<2x32xf32>
    %394 = arith.mulf %374, %384 : vector<2x32xf32>
    %395 = arith.addf %393, %394 : vector<2x32xf32>
    %396 = math.tanh %395 : vector<2x32xf32>
    %397 = arith.mulf %392, %396 : vector<2x32xf32>
    %398 = vector.extract_strided_slice %5 {offsets = [12, 0], sizes = [2, 128], strides = [1, 1]} : vector<16x128xf32> to vector<2x128xf32>
    %cst_132 = arith.constant dense<0.000000e+00> : vector<2x128xf32>
    %399 = tpu.matmul %361, %6, %cst_132 {dimension_numbers = #tpu.dot_dimension_numbers<[1], [0], [0], [1], [0, 0, 1, 1], [], []>} : vector<2x32xf32>, vector<32x128xf32>, vector<2x128xf32> -> vector<2x128xf32>
    %400 = arith.addf %398, %399 : vector<2x128xf32>
    %401 = vector.extract_strided_slice %400 {offsets = [0, 0], sizes = [2, 32], strides = [1, 1]} : vector<2x128xf32> to vector<2x32xf32>
    %cst_133 = arith.constant 0.000000e+00 : f32
    %402 = vector.broadcast %cst_133 : f32 to vector<2x32xf32>
    %403 = arith.subf %402, %401 : vector<2x32xf32>
    %404 = math.exp %403 : vector<2x32xf32>
    %cst_134 = arith.constant 1.000000e+00 : f32
    %405 = vector.broadcast %cst_134 : f32 to vector<2x32xf32>
    %406 = arith.addf %405, %404 : vector<2x32xf32>
    %cst_135 = arith.constant 1.000000e+00 : f32
    %407 = vector.broadcast %cst_135 : f32 to vector<2x32xf32>
    %408 = arith.divf %407, %406 : vector<2x32xf32>
    %409 = vector.extract_strided_slice %400 {offsets = [0, 32], sizes = [2, 32], strides = [1, 1]} : vector<2x128xf32> to vector<2x32xf32>
    %cst_136 = arith.constant 0.000000e+00 : f32
    %410 = vector.broadcast %cst_136 : f32 to vector<2x32xf32>
    %411 = arith.subf %410, %409 : vector<2x32xf32>
    %412 = math.exp %411 : vector<2x32xf32>
    %cst_137 = arith.constant 1.000000e+00 : f32
    %413 = vector.broadcast %cst_137 : f32 to vector<2x32xf32>
    %414 = arith.addf %413, %412 : vector<2x32xf32>
    %cst_138 = arith.constant 1.000000e+00 : f32
    %415 = vector.broadcast %cst_138 : f32 to vector<2x32xf32>
    %416 = arith.divf %415, %414 : vector<2x32xf32>
    %417 = vector.extract_strided_slice %400 {offsets = [0, 64], sizes = [2, 32], strides = [1, 1]} : vector<2x128xf32> to vector<2x32xf32>
    %418 = math.tanh %417 : vector<2x32xf32>
    %419 = vector.extract_strided_slice %400 {offsets = [0, 96], sizes = [2, 32], strides = [1, 1]} : vector<2x128xf32> to vector<2x32xf32>
    %cst_139 = arith.constant 0.000000e+00 : f32
    %420 = vector.broadcast %cst_139 : f32 to vector<2x32xf32>
    %421 = arith.subf %420, %419 : vector<2x32xf32>
    %422 = math.exp %421 : vector<2x32xf32>
    %cst_140 = arith.constant 1.000000e+00 : f32
    %423 = vector.broadcast %cst_140 : f32 to vector<2x32xf32>
    %424 = arith.addf %423, %422 : vector<2x32xf32>
    %cst_141 = arith.constant 1.000000e+00 : f32
    %425 = vector.broadcast %cst_141 : f32 to vector<2x32xf32>
    %426 = arith.divf %425, %424 : vector<2x32xf32>
    %427 = arith.mulf %416, %359 : vector<2x32xf32>
    %428 = arith.mulf %408, %418 : vector<2x32xf32>
    %429 = arith.addf %427, %428 : vector<2x32xf32>
    %430 = math.tanh %429 : vector<2x32xf32>
    %431 = arith.mulf %426, %430 : vector<2x32xf32>
    %cst_142 = arith.constant dense<0.000000e+00> : vector<2x128xf32>
    %432 = tpu.matmul %361, %8, %cst_142 {dimension_numbers = #tpu.dot_dimension_numbers<[1], [0], [0], [1], [0, 0, 1, 1], [], []>} : vector<2x32xf32>, vector<32x128xf32>, vector<2x128xf32> -> vector<2x128xf32>
    %cst_143 = arith.constant dense<0.000000e+00> : vector<2x128xf32>
    %433 = tpu.matmul %397, %7, %cst_143 {dimension_numbers = #tpu.dot_dimension_numbers<[1], [0], [0], [1], [0, 0, 1, 1], [], []>} : vector<2x32xf32>, vector<32x128xf32>, vector<2x128xf32> -> vector<2x128xf32>
    %434 = arith.addf %432, %433 : vector<2x128xf32>
    %435 = vector.broadcast %9 : vector<1x128xf32> to vector<2x128xf32>
    %436 = arith.addf %434, %435 : vector<2x128xf32>
    %437 = vector.extract_strided_slice %436 {offsets = [0, 0], sizes = [2, 32], strides = [1, 1]} : vector<2x128xf32> to vector<2x32xf32>
    %cst_144 = arith.constant 0.000000e+00 : f32
    %438 = vector.broadcast %cst_144 : f32 to vector<2x32xf32>
    %439 = arith.subf %438, %437 : vector<2x32xf32>
    %440 = math.exp %439 : vector<2x32xf32>
    %cst_145 = arith.constant 1.000000e+00 : f32
    %441 = vector.broadcast %cst_145 : f32 to vector<2x32xf32>
    %442 = arith.addf %441, %440 : vector<2x32xf32>
    %cst_146 = arith.constant 1.000000e+00 : f32
    %443 = vector.broadcast %cst_146 : f32 to vector<2x32xf32>
    %444 = arith.divf %443, %442 : vector<2x32xf32>
    %445 = vector.extract_strided_slice %436 {offsets = [0, 32], sizes = [2, 32], strides = [1, 1]} : vector<2x128xf32> to vector<2x32xf32>
    %cst_147 = arith.constant 0.000000e+00 : f32
    %446 = vector.broadcast %cst_147 : f32 to vector<2x32xf32>
    %447 = arith.subf %446, %445 : vector<2x32xf32>
    %448 = math.exp %447 : vector<2x32xf32>
    %cst_148 = arith.constant 1.000000e+00 : f32
    %449 = vector.broadcast %cst_148 : f32 to vector<2x32xf32>
    %450 = arith.addf %449, %448 : vector<2x32xf32>
    %cst_149 = arith.constant 1.000000e+00 : f32
    %451 = vector.broadcast %cst_149 : f32 to vector<2x32xf32>
    %452 = arith.divf %451, %450 : vector<2x32xf32>
    %453 = vector.extract_strided_slice %436 {offsets = [0, 64], sizes = [2, 32], strides = [1, 1]} : vector<2x128xf32> to vector<2x32xf32>
    %454 = math.tanh %453 : vector<2x32xf32>
    %455 = vector.extract_strided_slice %436 {offsets = [0, 96], sizes = [2, 32], strides = [1, 1]} : vector<2x128xf32> to vector<2x32xf32>
    %cst_150 = arith.constant 0.000000e+00 : f32
    %456 = vector.broadcast %cst_150 : f32 to vector<2x32xf32>
    %457 = arith.subf %456, %455 : vector<2x32xf32>
    %458 = math.exp %457 : vector<2x32xf32>
    %cst_151 = arith.constant 1.000000e+00 : f32
    %459 = vector.broadcast %cst_151 : f32 to vector<2x32xf32>
    %460 = arith.addf %459, %458 : vector<2x32xf32>
    %cst_152 = arith.constant 1.000000e+00 : f32
    %461 = vector.broadcast %cst_152 : f32 to vector<2x32xf32>
    %462 = arith.divf %461, %460 : vector<2x32xf32>
    %463 = arith.mulf %452, %395 : vector<2x32xf32>
    %464 = arith.mulf %444, %454 : vector<2x32xf32>
    %465 = arith.addf %463, %464 : vector<2x32xf32>
    %466 = math.tanh %465 : vector<2x32xf32>
    %467 = arith.mulf %462, %466 : vector<2x32xf32>
    %468 = vector.extract_strided_slice %5 {offsets = [14, 0], sizes = [2, 128], strides = [1, 1]} : vector<16x128xf32> to vector<2x128xf32>
    %cst_153 = arith.constant dense<0.000000e+00> : vector<2x128xf32>
    %469 = tpu.matmul %431, %6, %cst_153 {dimension_numbers = #tpu.dot_dimension_numbers<[1], [0], [0], [1], [0, 0, 1, 1], [], []>} : vector<2x32xf32>, vector<32x128xf32>, vector<2x128xf32> -> vector<2x128xf32>
    %470 = arith.addf %468, %469 : vector<2x128xf32>
    %471 = vector.extract_strided_slice %470 {offsets = [0, 0], sizes = [2, 32], strides = [1, 1]} : vector<2x128xf32> to vector<2x32xf32>
    %cst_154 = arith.constant 0.000000e+00 : f32
    %472 = vector.broadcast %cst_154 : f32 to vector<2x32xf32>
    %473 = arith.subf %472, %471 : vector<2x32xf32>
    %474 = math.exp %473 : vector<2x32xf32>
    %cst_155 = arith.constant 1.000000e+00 : f32
    %475 = vector.broadcast %cst_155 : f32 to vector<2x32xf32>
    %476 = arith.addf %475, %474 : vector<2x32xf32>
    %cst_156 = arith.constant 1.000000e+00 : f32
    %477 = vector.broadcast %cst_156 : f32 to vector<2x32xf32>
    %478 = arith.divf %477, %476 : vector<2x32xf32>
    %479 = vector.extract_strided_slice %470 {offsets = [0, 32], sizes = [2, 32], strides = [1, 1]} : vector<2x128xf32> to vector<2x32xf32>
    %cst_157 = arith.constant 0.000000e+00 : f32
    %480 = vector.broadcast %cst_157 : f32 to vector<2x32xf32>
    %481 = arith.subf %480, %479 : vector<2x32xf32>
    %482 = math.exp %481 : vector<2x32xf32>
    %cst_158 = arith.constant 1.000000e+00 : f32
    %483 = vector.broadcast %cst_158 : f32 to vector<2x32xf32>
    %484 = arith.addf %483, %482 : vector<2x32xf32>
    %cst_159 = arith.constant 1.000000e+00 : f32
    %485 = vector.broadcast %cst_159 : f32 to vector<2x32xf32>
    %486 = arith.divf %485, %484 : vector<2x32xf32>
    %487 = vector.extract_strided_slice %470 {offsets = [0, 64], sizes = [2, 32], strides = [1, 1]} : vector<2x128xf32> to vector<2x32xf32>
    %488 = math.tanh %487 : vector<2x32xf32>
    %489 = vector.extract_strided_slice %470 {offsets = [0, 96], sizes = [2, 32], strides = [1, 1]} : vector<2x128xf32> to vector<2x32xf32>
    %cst_160 = arith.constant 0.000000e+00 : f32
    %490 = vector.broadcast %cst_160 : f32 to vector<2x32xf32>
    %491 = arith.subf %490, %489 : vector<2x32xf32>
    %492 = math.exp %491 : vector<2x32xf32>
    %cst_161 = arith.constant 1.000000e+00 : f32
    %493 = vector.broadcast %cst_161 : f32 to vector<2x32xf32>
    %494 = arith.addf %493, %492 : vector<2x32xf32>
    %cst_162 = arith.constant 1.000000e+00 : f32
    %495 = vector.broadcast %cst_162 : f32 to vector<2x32xf32>
    %496 = arith.divf %495, %494 : vector<2x32xf32>
    %497 = arith.mulf %486, %429 : vector<2x32xf32>
    %498 = arith.mulf %478, %488 : vector<2x32xf32>
    %499 = arith.addf %497, %498 : vector<2x32xf32>
    %500 = math.tanh %499 : vector<2x32xf32>
    %501 = arith.mulf %496, %500 : vector<2x32xf32>
    %cst_163 = arith.constant dense<0.000000e+00> : vector<2x128xf32>
    %502 = tpu.matmul %431, %8, %cst_163 {dimension_numbers = #tpu.dot_dimension_numbers<[1], [0], [0], [1], [0, 0, 1, 1], [], []>} : vector<2x32xf32>, vector<32x128xf32>, vector<2x128xf32> -> vector<2x128xf32>
    %cst_164 = arith.constant dense<0.000000e+00> : vector<2x128xf32>
    %503 = tpu.matmul %467, %7, %cst_164 {dimension_numbers = #tpu.dot_dimension_numbers<[1], [0], [0], [1], [0, 0, 1, 1], [], []>} : vector<2x32xf32>, vector<32x128xf32>, vector<2x128xf32> -> vector<2x128xf32>
    %504 = arith.addf %502, %503 : vector<2x128xf32>
    %505 = vector.broadcast %9 : vector<1x128xf32> to vector<2x128xf32>
    %506 = arith.addf %504, %505 : vector<2x128xf32>
    %507 = vector.extract_strided_slice %506 {offsets = [0, 0], sizes = [2, 32], strides = [1, 1]} : vector<2x128xf32> to vector<2x32xf32>
    %cst_165 = arith.constant 0.000000e+00 : f32
    %508 = vector.broadcast %cst_165 : f32 to vector<2x32xf32>
    %509 = arith.subf %508, %507 : vector<2x32xf32>
    %510 = math.exp %509 : vector<2x32xf32>
    %cst_166 = arith.constant 1.000000e+00 : f32
    %511 = vector.broadcast %cst_166 : f32 to vector<2x32xf32>
    %512 = arith.addf %511, %510 : vector<2x32xf32>
    %cst_167 = arith.constant 1.000000e+00 : f32
    %513 = vector.broadcast %cst_167 : f32 to vector<2x32xf32>
    %514 = arith.divf %513, %512 : vector<2x32xf32>
    %515 = vector.extract_strided_slice %506 {offsets = [0, 32], sizes = [2, 32], strides = [1, 1]} : vector<2x128xf32> to vector<2x32xf32>
    %cst_168 = arith.constant 0.000000e+00 : f32
    %516 = vector.broadcast %cst_168 : f32 to vector<2x32xf32>
    %517 = arith.subf %516, %515 : vector<2x32xf32>
    %518 = math.exp %517 : vector<2x32xf32>
    %cst_169 = arith.constant 1.000000e+00 : f32
    %519 = vector.broadcast %cst_169 : f32 to vector<2x32xf32>
    %520 = arith.addf %519, %518 : vector<2x32xf32>
    %cst_170 = arith.constant 1.000000e+00 : f32
    %521 = vector.broadcast %cst_170 : f32 to vector<2x32xf32>
    %522 = arith.divf %521, %520 : vector<2x32xf32>
    %523 = vector.extract_strided_slice %506 {offsets = [0, 64], sizes = [2, 32], strides = [1, 1]} : vector<2x128xf32> to vector<2x32xf32>
    %524 = math.tanh %523 : vector<2x32xf32>
    %525 = vector.extract_strided_slice %506 {offsets = [0, 96], sizes = [2, 32], strides = [1, 1]} : vector<2x128xf32> to vector<2x32xf32>
    %cst_171 = arith.constant 0.000000e+00 : f32
    %526 = vector.broadcast %cst_171 : f32 to vector<2x32xf32>
    %527 = arith.subf %526, %525 : vector<2x32xf32>
    %528 = math.exp %527 : vector<2x32xf32>
    %cst_172 = arith.constant 1.000000e+00 : f32
    %529 = vector.broadcast %cst_172 : f32 to vector<2x32xf32>
    %530 = arith.addf %529, %528 : vector<2x32xf32>
    %cst_173 = arith.constant 1.000000e+00 : f32
    %531 = vector.broadcast %cst_173 : f32 to vector<2x32xf32>
    %532 = arith.divf %531, %530 : vector<2x32xf32>
    %533 = arith.mulf %522, %465 : vector<2x32xf32>
    %534 = arith.mulf %514, %524 : vector<2x32xf32>
    %535 = arith.addf %533, %534 : vector<2x32xf32>
    %536 = math.tanh %535 : vector<2x32xf32>
    %537 = arith.mulf %532, %536 : vector<2x32xf32>
    %cst_174 = arith.constant dense<0.000000e+00> : vector<2x128xf32>
    %538 = tpu.matmul %501, %8, %cst_174 {dimension_numbers = #tpu.dot_dimension_numbers<[1], [0], [0], [1], [0, 0, 1, 1], [], []>} : vector<2x32xf32>, vector<32x128xf32>, vector<2x128xf32> -> vector<2x128xf32>
    %cst_175 = arith.constant dense<0.000000e+00> : vector<2x128xf32>
    %539 = tpu.matmul %537, %7, %cst_175 {dimension_numbers = #tpu.dot_dimension_numbers<[1], [0], [0], [1], [0, 0, 1, 1], [], []>} : vector<2x32xf32>, vector<32x128xf32>, vector<2x128xf32> -> vector<2x128xf32>
    %540 = arith.addf %538, %539 : vector<2x128xf32>
    %541 = vector.broadcast %9 : vector<1x128xf32> to vector<2x128xf32>
    %542 = arith.addf %540, %541 : vector<2x128xf32>
    %543 = vector.extract_strided_slice %542 {offsets = [0, 0], sizes = [2, 32], strides = [1, 1]} : vector<2x128xf32> to vector<2x32xf32>
    %cst_176 = arith.constant 0.000000e+00 : f32
    %544 = vector.broadcast %cst_176 : f32 to vector<2x32xf32>
    %545 = arith.subf %544, %543 : vector<2x32xf32>
    %546 = math.exp %545 : vector<2x32xf32>
    %cst_177 = arith.constant 1.000000e+00 : f32
    %547 = vector.broadcast %cst_177 : f32 to vector<2x32xf32>
    %548 = arith.addf %547, %546 : vector<2x32xf32>
    %cst_178 = arith.constant 1.000000e+00 : f32
    %549 = vector.broadcast %cst_178 : f32 to vector<2x32xf32>
    %550 = arith.divf %549, %548 : vector<2x32xf32>
    %551 = vector.extract_strided_slice %542 {offsets = [0, 32], sizes = [2, 32], strides = [1, 1]} : vector<2x128xf32> to vector<2x32xf32>
    %cst_179 = arith.constant 0.000000e+00 : f32
    %552 = vector.broadcast %cst_179 : f32 to vector<2x32xf32>
    %553 = arith.subf %552, %551 : vector<2x32xf32>
    %554 = math.exp %553 : vector<2x32xf32>
    %cst_180 = arith.constant 1.000000e+00 : f32
    %555 = vector.broadcast %cst_180 : f32 to vector<2x32xf32>
    %556 = arith.addf %555, %554 : vector<2x32xf32>
    %cst_181 = arith.constant 1.000000e+00 : f32
    %557 = vector.broadcast %cst_181 : f32 to vector<2x32xf32>
    %558 = arith.divf %557, %556 : vector<2x32xf32>
    %559 = vector.extract_strided_slice %542 {offsets = [0, 64], sizes = [2, 32], strides = [1, 1]} : vector<2x128xf32> to vector<2x32xf32>
    %560 = math.tanh %559 : vector<2x32xf32>
    %561 = vector.extract_strided_slice %542 {offsets = [0, 96], sizes = [2, 32], strides = [1, 1]} : vector<2x128xf32> to vector<2x32xf32>
    %cst_182 = arith.constant 0.000000e+00 : f32
    %562 = vector.broadcast %cst_182 : f32 to vector<2x32xf32>
    %563 = arith.subf %562, %561 : vector<2x32xf32>
    %564 = math.exp %563 : vector<2x32xf32>
    %cst_183 = arith.constant 1.000000e+00 : f32
    %565 = vector.broadcast %cst_183 : f32 to vector<2x32xf32>
    %566 = arith.addf %565, %564 : vector<2x32xf32>
    %cst_184 = arith.constant 1.000000e+00 : f32
    %567 = vector.broadcast %cst_184 : f32 to vector<2x32xf32>
    %568 = arith.divf %567, %566 : vector<2x32xf32>
    %569 = arith.mulf %558, %535 : vector<2x32xf32>
    %570 = arith.mulf %550, %560 : vector<2x32xf32>
    %571 = arith.addf %569, %570 : vector<2x32xf32>
    %572 = math.tanh %571 : vector<2x32xf32>
    %573 = arith.mulf %568, %572 : vector<2x32xf32>
    %574 = tpu.concatenate %117, %187, %257, %327, %397, %467, %537, %573 in 0 : vector<2x32xf32>, vector<2x32xf32>, vector<2x32xf32>, vector<2x32xf32>, vector<2x32xf32>, vector<2x32xf32>, vector<2x32xf32>, vector<2x32xf32> -> vector<16x32xf32>
    %c0_185 = arith.constant 0 : index
    %c0_186 = arith.constant 0 : index
    %575 = vector.load %arg7[%c0_185, %c0_186] : memref<32x96xf32, #tpu.memory_space<vmem>>, vector<32x96xf32>
    %cst_187 = arith.constant dense<0.000000e+00> : vector<16x96xf32>
    %576 = tpu.matmul %574, %575, %cst_187 {dimension_numbers = #tpu.dot_dimension_numbers<[1], [0], [0], [1], [0, 0, 1, 1], [], []>} : vector<16x32xf32>, vector<32x96xf32>, vector<16x96xf32> -> vector<16x96xf32>
    %c0_188 = arith.constant 0 : index
    %c0_189 = arith.constant 0 : index
    %577 = vector.load %arg8[%c0_188, %c0_189] : memref<1x96xf32, #tpu.memory_space<vmem>>, vector<1x96xf32>
    %578 = vector.broadcast %577 : vector<1x96xf32> to vector<16x96xf32>
    %579 = arith.addf %576, %578 : vector<16x96xf32>
    %580 = vector.shape_cast %579 : vector<16x96xf32> to vector<8x2x96xf32>
    %581 = vector.extract_strided_slice %580 {offsets = [7, 0, 0], sizes = [1, 2, 32], strides = [1, 1, 1]} : vector<8x2x96xf32> to vector<1x2x32xf32>
    %582 = vector.shape_cast %581 : vector<1x2x32xf32> to vector<2x32xf32>
    %cst_190 = arith.constant 0.353553385 : f32
    %583 = vector.broadcast %cst_190 : f32 to vector<2x32xf32>
    %584 = arith.mulf %582, %583 : vector<2x32xf32>
    %585 = vector.extract_strided_slice %580 {offsets = [0, 0, 32], sizes = [8, 2, 32], strides = [1, 1, 1]} : vector<8x2x96xf32> to vector<8x2x32xf32>
    %586 = vector.extract_strided_slice %580 {offsets = [0, 0, 64], sizes = [8, 2, 32], strides = [1, 1, 1]} : vector<8x2x96xf32> to vector<8x2x32xf32>
    %587 = vector.shape_cast %584 : vector<2x32xf32> to vector<1x2x32xf32>
    %588 = vector.broadcast %587 : vector<1x2x32xf32> to vector<8x2x32xf32>
    %589 = arith.mulf %585, %588 : vector<8x2x32xf32>
    %590 = vector.shape_cast %589 : vector<8x2x32xf32> to vector<16x32xf32>
    %c0_191 = arith.constant 0 : index
    %c0_192 = arith.constant 0 : index
    %591 = vector.load %arg9[%c0_191, %c0_192] : memref<32x4xf32, #tpu.memory_space<vmem>>, vector<32x4xf32>
    %cst_193 = arith.constant dense<0.000000e+00> : vector<16x4xf32>
    %592 = tpu.matmul %590, %591, %cst_193 {dimension_numbers = #tpu.dot_dimension_numbers<[1], [0], [0], [1], [0, 0, 1, 1], [], []>} : vector<16x32xf32>, vector<32x4xf32>, vector<16x4xf32> -> vector<16x4xf32>
    %593 = vector.shape_cast %592 : vector<16x4xf32> to vector<8x2x4xf32>
    %cst_194 = arith.constant dense<0xFF800000> : vector<2x4xf32>
    %594 = vector.multi_reduction <maximumf>, %593, %cst_194 [0] : vector<8x2x4xf32> to vector<2x4xf32>
    %595 = vector.shape_cast %594 : vector<2x4xf32> to vector<1x2x4xf32>
    %596 = vector.broadcast %595 : vector<1x2x4xf32> to vector<8x2x4xf32>
    %597 = arith.subf %593, %596 : vector<8x2x4xf32>
    %598 = math.exp %597 : vector<8x2x4xf32>
    %cst_195 = arith.constant dense<0.000000e+00> : vector<2x4xf32>
    %599 = vector.multi_reduction <add>, %598, %cst_195 [0] : vector<8x2x4xf32> to vector<2x4xf32>
    %600 = vector.shape_cast %599 : vector<2x4xf32> to vector<1x2x4xf32>
    %601 = tpu.reciprocal %600 {approx = true} : vector<1x2x4xf32> -> vector<1x2x4xf32>
    %602 = vector.broadcast %601 : vector<1x2x4xf32> to vector<8x2x4xf32>
    %603 = arith.mulf %598, %602 : vector<8x2x4xf32>
    %604 = vector.shape_cast %603 : vector<8x2x4xf32> to vector<16x4xf32>
    %c0_196 = arith.constant 0 : index
    %c0_197 = arith.constant 0 : index
    %605 = vector.load %arg10[%c0_196, %c0_197] : memref<4x32xf32, #tpu.memory_space<vmem>>, vector<4x32xf32>
    %cst_198 = arith.constant dense<0.000000e+00> : vector<16x32xf32>
    %606 = tpu.matmul %604, %605, %cst_198 {dimension_numbers = #tpu.dot_dimension_numbers<[1], [0], [0], [1], [0, 0, 1, 1], [], []>} : vector<16x4xf32>, vector<4x32xf32>, vector<16x32xf32> -> vector<16x32xf32>
    %607 = vector.shape_cast %606 : vector<16x32xf32> to vector<8x2x32xf32>
    %608 = arith.mulf %607, %586 : vector<8x2x32xf32>
    %cst_199 = arith.constant dense<0.000000e+00> : vector<2x32xf32>
    %609 = vector.multi_reduction <add>, %608, %cst_199 [0] : vector<8x2x32xf32> to vector<2x32xf32>
    %c0_200 = arith.constant 0 : index
    %c0_201 = arith.constant 0 : index
    %610 = vector.load %arg11[%c0_200, %c0_201] : memref<32x32xf32, #tpu.memory_space<vmem>>, vector<32x32xf32>
    %cst_202 = arith.constant dense<0.000000e+00> : vector<2x32xf32>
    %611 = tpu.matmul %609, %610, %cst_202 {dimension_numbers = #tpu.dot_dimension_numbers<[1], [0], [0], [1], [0, 0, 1, 1], [], []>} : vector<2x32xf32>, vector<32x32xf32>, vector<2x32xf32> -> vector<2x32xf32>
    %c0_203 = arith.constant 0 : index
    %c0_204 = arith.constant 0 : index
    %612 = vector.load %arg12[%c0_203, %c0_204] : memref<1x32xf32, #tpu.memory_space<vmem>>, vector<1x32xf32>
    %613 = vector.broadcast %612 : vector<1x32xf32> to vector<2x32xf32>
    %614 = arith.addf %611, %613 : vector<2x32xf32>
    %c0_205 = arith.constant 0 : index
    %c0_206 = arith.constant 0 : index
    %615 = vector.load %arg13[%c0_205, %c0_206] : memref<32x4xf32, #tpu.memory_space<vmem>>, vector<32x4xf32>
    %cst_207 = arith.constant dense<0.000000e+00> : vector<2x4xf32>
    %616 = tpu.matmul %614, %615, %cst_207 {dimension_numbers = #tpu.dot_dimension_numbers<[1], [0], [0], [1], [0, 0, 1, 1], [], []>} : vector<2x32xf32>, vector<32x4xf32>, vector<2x4xf32> -> vector<2x4xf32>
    %c0_208 = arith.constant 0 : index
    %c0_209 = arith.constant 0 : index
    %617 = vector.load %arg14[%c0_208, %c0_209] : memref<1x4xf32, #tpu.memory_space<vmem>>, vector<1x4xf32>
    %618 = vector.broadcast %617 : vector<1x4xf32> to vector<2x4xf32>
    %619 = arith.addf %616, %618 : vector<2x4xf32>
    %c0_210 = arith.constant 0 : index
    %c0_211 = arith.constant 0 : index
    %620 = vector.load %arg15[%c0_210, %c0_211] : memref<2x4xf32, #tpu.memory_space<vmem>>, vector<2x4xf32>
    tpu.vector_store %arg15[%c0_210, %c0_211], %619 {strides = array<i32>} : memref<2x4xf32, #tpu.memory_space<vmem>>, vector<2x4xf32>,
    return
  }
}

</mosaic_0001>

<bundles_post_ra>
// kernel: _lambda_.1
= control target key start
LH: loop header
LB: loop body
LE: loop exit
PB: predicated region body
PF: predicated region fallthrough
CT: control target
= control target key end

     0   :  { %20 = vsyncpa [#allocation3], 0  ;;  %s5092_s0 = inlined_call_operand.vmem [shape: f32[16,16], index: 0, kind: input, shape index: {}]   ;;  %s5093_s1 = inlined_call_operand.hbm [shape: f32[16,128], index: 1, kind: input, shape index: {}]   ;;  %s5094_s2 = inlined_call_operand.hbm [shape: f32[32,128], index: 2, kind: input, shape index: {}]   ;;  %s5095_s3 = inlined_call_operand.hbm [shape: f32[1,128], index: 3, kind: input, shape index: {}]   ;;  %s5096_s4 = inlined_call_operand.hbm [shape: f32[32,128], index: 4, kind: input, shape index: {}]   ;;  %s5097_s5 = inlined_call_operand.hbm [shape: f32[32,128], index: 5, kind: input, shape index: {}]   ;;  %s5098_s6 = inlined_call_operand.hbm [shape: f32[1,128], index: 6, kind: input, shape index: {}]   ;;  %s5099_s7 = inlined_call_operand.hbm [shape: f32[32,96], index: 7, kind: input, shape index: {}]   ;;  %s5100_s8 = inlined_call_operand.hbm [shape: f32[1,96], index: 8, kind: input, shape index: {}]   ;;  %s5101_s9 = inlined_call_operand.hbm [shape: f32[32,4], index: 9, kind: input, shape index: {}]   ;;  %s5102_s10 = inlined_call_operand.vmem [shape: f32[4,32], index: 10, kind: input, shape index: {}]   ;;  %s5103_s11 = inlined_call_operand.vmem [shape: f32[32,32], index: 11, kind: input, shape index: {}]   ;;  %s5104_s12 = inlined_call_operand.vmem [shape: f32[1,32], index: 12, kind: input, shape index: {}]   ;;  %s5105_s13 = inlined_call_operand.vmem [shape: f32[32,4], index: 13, kind: input, shape index: {}]   ;;  %s5106_s14 = inlined_call_operand.vmem [shape: f32[1,4], index: 14, kind: input, shape index: {}]   ;;  %s5107_s15 = inlined_call_operand.hbm [shape: f32[2,4], index: 15, kind: output, shape index: {}]  }
   0x1   :  { %21 = vsyncpa [#allocation6], 0 }
   0x2   :  { %22 = vsyncpa [#allocation9], 0 }
   0x3   :  { %23 = vsyncpa [#allocation12], 0 }
   0x4   :  { %24 = vsyncpa [#allocation15], 0 }
   0x5   :  { %25 = vsyncpa [#allocation4], 0  ;;  %s4382_s18 = smov [#allocation5]   ;;  %s4383_s20 = smov [#allocation8]  }
   0x6   :  { %s45_s19 = sshll.u32 %s4382_s18, 4  ;;  %s67_s21 = sshll.u32 %s4383_s20, 4  ;;  %s46_s19 = int_to_ptr.vmem [resolvable:$true] %s45_s19  ;;  %s4481_s21 = int_to_ptr.vmem [resolvable:$true] %s67_s21 }
   0x7   :  { %s4150_s24 = scalar_lea.hbm %s5094_s2, 512 }
   0x8   :  { %p4151_p0 = scmp.ne.s32.totalorder %s5094_s2, %s4150_s24  ;;  %p4154_p1 = scmp.lt.u32.totalorder %s4150_s24, %s5094_s2 }
   0xa   :  { %p4156_p2 = pnand %p4154_p1, %p4151_p0 }
   0xc   :  { %4159 = shalt.err (!%p4156_p2)
}
   0xd   :  { %s4160_s29 = scalar_lea.vmem %s46_s19, 512  ;;  %p4165_p4 = scmp.lt.s32.totalorder %s46_s19, %s46_s19 }
   0xe   :  { %p4161_p3 = scmp.ne.s32.totalorder %s46_s19, %s4160_s29  ;;  %p4166_p5 = scmp.lt.s32.totalorder %s4160_s29, %s4160_s29 }
  0x10   :  { %p4167_p6 = por %p4166_p5, %p4165_p4 }
  0x12   :  { %p4168_p7 = pnand %p4167_p6, %p4161_p3 }
  0x14   :  { %4171 = shalt.err (!%p4168_p7)
}
  0x15   :  { %s4384_s30 = smov 128   ;;  %s4385_s16 = smov 8  }
  0x16   :  { %51 = dma.hbm_to_vmem [thread:$0]  %s5094_s2, 512, %s46_s19, [#allocation6], %s4384_s30, %s4384_s30, %s4385_s16  }
  0x17   :  { %s4172_s23 = scalar_lea.hbm %s5096_s4, 512 }
  0x18   :  { %p4173_p8 = scmp.ne.s32.totalorder %s5096_s4, %s4172_s23  ;;  %p4176_p9 = scmp.lt.u32.totalorder %s4172_s23, %s5096_s4 }
  0x1a   :  { %p4178_p10 = pnand %p4176_p9, %p4173_p8 }
  0x1c   :  { %4181 = shalt.err (!%p4178_p10)
}
  0x1d   :  { %s4182_s28 = scalar_lea.vmem %s4481_s21, 512  ;;  %p4187_p12 = scmp.lt.s32.totalorder %s4481_s21, %s4481_s21 }
  0x1e   :  { %p4183_p11 = scmp.ne.s32.totalorder %s4481_s21, %s4182_s28  ;;  %p4188_p13 = scmp.lt.s32.totalorder %s4182_s28, %s4182_s28 }
  0x20   :  { %p4189_p0 = por %p4188_p13, %p4187_p12 }
  0x22   :  { %p4190_p1 = pnand %p4189_p0, %p4183_p11 }
  0x24   :  { %4193 = shalt.err (!%p4190_p1)
}
  0x25   :  { %73 = dma.hbm_to_vmem [thread:$0]  %s5096_s4, 512, %s4481_s21, [#allocation9], %s4384_s30, %s4384_s30, %s4385_s16  }
  0x26   :  { %s4386_s29 = smov [#allocation11]   ;;  %s4387_s18 = smov [#allocation14]  }
  0x27   :  { %s92_s17 = sshll.u32 %s4386_s29, 4  ;;  %s114_s20 = sshll.u32 %s4387_s18, 4  ;;  %s93_s17 = int_to_ptr.vmem [resolvable:$true] %s92_s17  ;;  %s115_s20 = int_to_ptr.vmem [resolvable:$true] %s114_s20 }
  0x28   :  { %s4194_s24 = scalar_lea.hbm %s5098_s6, 16 }
  0x29   :  { %p4195_p2 = scmp.ne.s32.totalorder %s5098_s6, %s4194_s24  ;;  %p4198_p3 = scmp.lt.u32.totalorder %s4194_s24, %s5098_s6 }
  0x2b   :  { %p4200_p4 = pnand %p4198_p3, %p4195_p2 }
  0x2d   :  { %4203 = shalt.err (!%p4200_p4)
}
  0x2e   :  { %s4204_s4 = scalar_lea.vmem %s93_s17, 16  ;;  %s4208_s21 = scalar_lea.vmem %s93_s17, 32 }
  0x2f   :  { %p4205_p5 = scmp.ne.s32.totalorder %s93_s17, %s4204_s4  ;;  %p4209_p6 = scmp.lt.s32.totalorder %s93_s17, %s93_s17 }
  0x30   :  { %p4210_p7 = scmp.lt.s32.totalorder %s4208_s21, %s4204_s4 }
  0x32   :  { %p4211_p8 = por %p4210_p7, %p4209_p6 }
  0x34   :  { %p4212_p9 = pnand %p4211_p8, %p4205_p5 }
  0x36   :  { %4215 = shalt.err (!%p4212_p9)
}
  0x37   :  { %95 = dma.hbm_to_vmem [thread:$0]  %s5098_s6, 16, %s93_s17, [#allocation12]  }
  0x38   :  { %s4216_s22 = scalar_lea.hbm %s5100_s8, 16 }
  0x39   :  { %p4217_p10 = scmp.ne.s32.totalorder %s5100_s8, %s4216_s22  ;;  %p4220_p11 = scmp.lt.u32.totalorder %s4216_s22, %s5100_s8 }
  0x3b   :  { %p4222_p12 = pnand %p4220_p11, %p4217_p10 }
  0x3d   :  { %4225 = shalt.err (!%p4222_p12)
}
  0x3e   :  { %s4226_s27 = scalar_lea.vmem %s115_s20, 16  ;;  %s4230_s28 = scalar_lea.vmem %s115_s20, 32 }
  0x3f   :  { %p4227_p13 = scmp.ne.s32.totalorder %s115_s20, %s4226_s27  ;;  %p4231_p0 = scmp.lt.s32.totalorder %s115_s20, %s115_s20 }
  0x40   :  { %p4232_p1 = scmp.lt.s32.totalorder %s4230_s28, %s4226_s27 }
  0x42   :  { %p4233_p2 = por %p4232_p1, %p4231_p0 }
  0x44   :  { %p4234_p3 = pnand %p4233_p2, %p4227_p13 }
  0x46   :  { %4237 = shalt.err (!%p4234_p3)
}
  0x47   :  { %117 = dma.hbm_to_vmem [thread:$0]  %s5100_s8, 16, %s115_s20, [#allocation15]  }
  0x48   :  { %s4388_s4 = smov [#allocation2]   ;;  %s4389_s2 = smov [#allocation7]  }
  0x49   :  { %s33_s21 = sshll.u32 %s4388_s4, 4  ;;  %s58_s19 = sshll.u32 %s4389_s2, 4  ;;  %s34_s21 = int_to_ptr.vmem [resolvable:$true] %s33_s21  ;;  %s59_s19 = int_to_ptr.vmem [resolvable:$true] %s58_s19 }
  0x4a   :  { %s4238_s22 = scalar_lea.hbm %s5093_s1, 256 }
  0x4b   :  { %p4239_p4 = scmp.ne.s32.totalorder %s5093_s1, %s4238_s22  ;;  %p4242_p5 = scmp.lt.u32.totalorder %s4238_s22, %s5093_s1 }
  0x4d   :  { %p4244_p6 = pnand %p4242_p5, %p4239_p4 }
  0x4f   :  { %4247 = shalt.err (!%p4244_p6)
}
  0x50   :  { %s4248_s8 = scalar_lea.vmem %s34_s21, 256  ;;  %p4253_p8 = scmp.lt.s32.totalorder %s34_s21, %s34_s21 }
  0x51   :  { %p4249_p7 = scmp.ne.s32.totalorder %s34_s21, %s4248_s8  ;;  %p4254_p9 = scmp.lt.s32.totalorder %s4248_s8, %s4248_s8 }
  0x53   :  { %p4255_p10 = por %p4254_p9, %p4253_p8 }
  0x55   :  { %p4256_p11 = pnand %p4255_p10, %p4249_p7 }
  0x57   :  { %4259 = shalt.err (!%p4256_p11)
}
  0x58   :  { %39 = dma.hbm_to_vmem [thread:$0]  %s5093_s1, 256, %s34_s21, [#allocation3], %s4384_s30, %s4384_s30, %s4385_s16  }
  0x59   :  { %s4260_s17 = scalar_lea.hbm %s5095_s3, 16 }
  0x5a   :  { %p4261_p12 = scmp.ne.s32.totalorder %s5095_s3, %s4260_s17  ;;  %p4264_p13 = scmp.lt.u32.totalorder %s4260_s17, %s5095_s3 }
  0x5c   :  { %p4266_p0 = pnand %p4264_p13, %p4261_p12 }
  0x5e   :  { %4269 = shalt.err (!%p4266_p0)
}
  0x5f   :  { %s4270_s22 = scalar_lea.vmem %s59_s19, 16  ;;  %s4274_s23 = scalar_lea.vmem %s59_s19, 32 }
  0x60   :  { %p4271_p1 = scmp.ne.s32.totalorder %s59_s19, %s4270_s22  ;;  %p4275_p2 = scmp.lt.s32.totalorder %s59_s19, %s59_s19 }
  0x61   :  { %p4276_p3 = scmp.lt.s32.totalorder %s4274_s23, %s4270_s22 }
  0x63   :  { %p4277_p4 = por %p4276_p3, %p4275_p2 }
  0x65   :  { %p4278_p5 = pnand %p4277_p4, %p4271_p1 }
  0x67   :  { %4281 = shalt.err (!%p4278_p5)
}
  0x68   :  { %61 = dma.hbm_to_vmem [thread:$0]  %s5095_s3, 16, %s59_s19, [#allocation6]  }
  0x69   :  { %s4390_s24 = smov [#allocation10]   ;;  %s4391_s26 = smov [#allocation13]  }
  0x6a   :  { %s79_s25 = sshll.u32 %s4390_s24, 4  ;;  %s101_s8 = sshll.u32 %s4391_s26, 4  ;;  %s80_s25 = int_to_ptr.vmem [resolvable:$true] %s79_s25  ;;  %s4569_s8 = int_to_ptr.vmem [resolvable:$true] %s101_s8 }
  0x6b   :  { %s4282_s28 = scalar_lea.hbm %s5097_s5, 512 }
  0x6c   :  { %p4283_p6 = scmp.ne.s32.totalorder %s5097_s5, %s4282_s28  ;;  %p4286_p7 = scmp.lt.u32.totalorder %s4282_s28, %s5097_s5 }
  0x6e   :  { %p4288_p8 = pnand %p4286_p7, %p4283_p6 }
  0x70   :  { %4291 = shalt.err (!%p4288_p8)
}
  0x71   :  { %s4292_s3 = scalar_lea.vmem %s80_s25, 512  ;;  %p4297_p10 = scmp.lt.s32.totalorder %s80_s25, %s80_s25 }
  0x72   :  { %p4293_p9 = scmp.ne.s32.totalorder %s80_s25, %s4292_s3  ;;  %p4298_p11 = scmp.lt.s32.totalorder %s4292_s3, %s4292_s3 }
  0x74   :  { %p4299_p12 = por %p4298_p11, %p4297_p10 }
  0x76   :  { %p4300_p13 = pnand %p4299_p12, %p4293_p9 }
  0x78   :  { %4303 = shalt.err (!%p4300_p13)
}
  0x79   :  { %85 = dma.hbm_to_vmem [thread:$0]  %s5097_s5, 512, %s80_s25, [#allocation9], %s4384_s30, %s4384_s30, %s4385_s16  }
  0x7a   :  { %s4304_s23 = scalar_lea.hbm %s5099_s7, 512 }
  0x7b   :  { %p4305_p0 = scmp.ne.s32.totalorder %s5099_s7, %s4304_s23  ;;  %p4308_p1 = scmp.lt.u32.totalorder %s4304_s23, %s5099_s7 }
  0x7d   :  { %p4310_p2 = pnand %p4308_p1, %p4305_p0 }
  0x7f   :  { %4313 = shalt.err (!%p4310_p2)
}
  0x80   :  { %s4314_s20 = scalar_lea.vmem %s4569_s8, 512  ;;  %p4319_p4 = scmp.lt.s32.totalorder %s4569_s8, %s4569_s8 }
  0x81   :  { %p4315_p3 = scmp.ne.s32.totalorder %s4569_s8, %s4314_s20  ;;  %p4320_p5 = scmp.lt.s32.totalorder %s4314_s20, %s4314_s20 }
  0x83   :  { %p4321_p6 = por %p4320_p5, %p4319_p4 }
  0x85   :  { %p4322_p7 = pnand %p4321_p6, %p4315_p3 }
  0x87   :  { %4325 = shalt.err (!%p4322_p7)
}
  0x88   :  { %107 = dma.hbm_to_vmem [thread:$0]  %s5099_s7, 512, %s4569_s8, [#allocation12], %s4384_s30, %s4384_s30, %s4385_s16  }
  0x89   :  { %s4392_s27 = smov [#allocation16]   ;;  %s4326_s4 = scalar_lea.hbm %s5101_s9, 512 }
  0x8a   :  { %s123_s28 = sshll.u32 %s4392_s27, 4  ;;  %p4327_p8 = scmp.ne.s32.totalorder %s5101_s9, %s4326_s4  ;;  %s124_s28 = int_to_ptr.vmem [resolvable:$true] %s123_s28 }
  0x8b   :  { %p4330_p9 = scmp.lt.u32.totalorder %s4326_s4, %s5101_s9 }
  0x8d   :  { %p4332_p10 = pnand %p4330_p9, %p4327_p8 }
  0x8f   :  { %4335 = shalt.err (!%p4332_p10)
}
  0x90   :  { %s4336_s18 = scalar_lea.vmem %s124_s28, 512  ;;  %p4341_p12 = scmp.lt.s32.totalorder %s124_s28, %s124_s28 }
  0x91   :  { %p4337_p11 = scmp.ne.s32.totalorder %s124_s28, %s4336_s18  ;;  %p4342_p13 = scmp.lt.s32.totalorder %s4336_s18, %s4336_s18 }
  0x93   :  { %p4343_p0 = por %p4342_p13, %p4341_p12 }
  0x95   :  { %p4344_p1 = pnand %p4343_p0, %p4337_p11 }
  0x97   :  { %4347 = shalt.err (!%p4344_p1)
}
  0x98   :  { %129 = dma.hbm_to_vmem [thread:$0]  %s5101_s9, 512, %s124_s28, [#allocation15], %s4384_s30, %s4384_s30, %s4385_s16  }
  0x99   :  { %4370 = dma.done.wait [#allocation3], 256  }
  0x9a   :  { %4371 = vsyncadd [#allocation3], 4294967040 }
  0x9b   :  { %4372 = dma.done.wait [#allocation6], 528  }
  0x9c   :  { %4373 = vsyncadd [#allocation6], 4294966768 }
  0x9d   :  { %4374 = dma.done.wait [#allocation9], 1024  }
  0x9e   :  { %4375 = vsyncadd [#allocation9], 4294966272 }
  0x9f   :  { %4376 = dma.done.wait [#allocation12], 528  }
  0xa0   :  { %4377 = vsyncadd [#allocation12], 4294966768 }
  0xa1   :  { %4378 = dma.done.wait [#allocation15], 528  }
  0xa2   :  { %4379 = vsyncadd [#allocation15], 4294966768  ;;  %v4393_v0 = vmov 0.0|0.0   ;;  %vm4394_vm0 = vmmov 0   ;;  %v4395_v1 = vmov 0.0   ;;  %vm178_vm1 = vcmask 130048  }
  0xa3   :  { %3812 = vmatprep.subr.bf16.mxu1 %v4393_v0  ;;  %3503 = vmatprep.mubr.msk.f32.mxu1 %vm4394_vm0, %v4395_v1  ;;  %v167_v2 = vld [vmem:[#allocation2] sm:$0xff]  ;;  %v168_v3 = vld [vmem:[#allocation2 + $0x8] sm:$0xff]  ;;  %v260_v4 = vld [vmem:[#allocation5] sm:$0xff]  ;;  %s4397_s23 = smov 32   ;;  %vm273_vm2 = vcmask 261120   ;;  %vm2496_vm3 = vcmask 1041408  }
  0xa4   :  { %v3808_v5 = vpack.c.bf16 %v168_v3, %v167_v2  ;;  %v261_v6 = vld [vmem:[#allocation5 + $0x8] sm:$0xff]  ;;  %v170_v7 = vld [vmem:[%s5092_s0] sm:$0xff]  ;;  %v263_v10 = vld [vmem:[#allocation5 + $0x18] sm:$0xff]  ;;  %vm2498_vm4 = vcmask 1043456   ;;  %vm2500_vm5 = vcmask 1045504   ;;  %s4399_s1 = smov 96  }
  0xa5   :  { %v4627_v8 = vpack.c.bf16 %v261_v6, %v260_v4  ;;  %3492 = vmatprep.mubr.msk.f32.mxu0 %vm178_vm1, %v170_v7  ;;  %v262_v9 = vld [vmem:[#allocation5 + $0x10] sm:$0xff]  ;;  %v171_v11 = vld [vmem:[%s5092_s0 + $0x8] sm:$0xff]  ;;  %v3301_v13 = vld [vmem:[#allocation7] ss:$0 sm:$0xff]  ;;  %s4396_s0 = smov 64   ;;  %vm2831_vm6 = vcmask 25600  }
  0xa6   :  { %3809 = vmatprep.subr.bf16.mxu0 %v3808_v5  ;;  %v4634_v12 = vpack.c.bf16 %v263_v10, %v262_v9  ;;  %v264_v33 = vld [vmem:[#allocation10] sm:$0xff]  ;;  %v265_v34 = vld [vmem:[#allocation10 + $0x8] sm:$0xff]  ;;  %v266_v36 = vld [vmem:[#allocation10 + $0x10] sm:$0xff]  ;;  %vm2938_vm7 = vcmask 31744   ;;  %vm3097_vm8 = vcmask 254976   ;;  %s4400_s16 = smov [#allocation17]  }
  0xa7   :  { %3814 = vmatpush3.bf16.msra.mxu1 %v4627_v8  ;;  %3811 = vmatpush3.bf16.msra.mxu0 %v3808_v5  ;;  %v4661_v35 = vpack.c.bf16 %v265_v34, %v264_v33  ;;  %v267_v37 = vld [vmem:[#allocation10 + $0x18] sm:$0xff]  ;;  %v268_v41 = vld [vmem:[#allocation8] sm:$0xff]  ;;  %v269_v42 = vld [vmem:[#allocation8 + $0x8] sm:$0xff]  ;;  %s3288_s22 = sshll.u32 %s4400_s16, 4  ;;  %s3289_s22 = int_to_ptr.vmem [resolvable:$true] %s3288_s22 }
  0xa8   :  { %3815 = vmatprep.subr.bf16.mxu1 %v4393_v0  ;;  %3818 = vmatprep.subr.bf16.mxu0 %v4393_v0  ;;  %v4665_v38 = vpack.c.bf16 %v267_v37, %v266_v36  ;;  %v4677_v43 = vpack.c.bf16 %v269_v42, %v268_v41  ;;  %v270_v44 = vld [vmem:[#allocation8 + $0x10] sm:$0xff]  ;;  %v271_v45 = vld [vmem:[#allocation8 + $0x18] sm:$0xff]  ;;  %v4696_v54 = vld [vmem:[#allocation11] ss:$0 sm:$0xff]  ;;  %p4353_p3 = scmp.lt.s32.totalorder %s3289_s22, %s3289_s22 }
  0xa9   :  { %v4681_v47 = vpack.c.bf16 %v271_v45, %v270_v44 }
  0xaa   :  { %3493 = vmatmul.mubr.msk.f32.vlgmr.msra.gmra.mrb[0].mxu0 %vm178_vm1, %v171_v11 }
  0xab   :  { %3817 = vmatpush3.bf16.msra.mxu1 %v4634_v12  ;;  %3820 = vmatpush3.bf16.msra.mxu0 %v4627_v8 }
  0xac   :  { %3821 = vmatprep.subr.bf16.mxu0 %v4393_v0  ;;  %3514 = vmatprep.mubr.msk.f32.mxu0 %vm4394_vm0, %v4395_v1 }
  0xad   :  { %3824 = vmatprep.subr.bf16.mxu1 %v4393_v0 }
  0xae   :  { %3504 = vmatmul.mubr.f32.vlgmr.msra.gmra.mrb[0].mxu1 %v4395_v1 }
  0xaf   :  { %3823 = vmatpush3.bf16.msra.mxu0 %v4634_v12  ;;  %3525 = vmatprep.mubr.msk.f32.mxu1 %vm4394_vm0, %v4395_v1 }
  0xb0   :  { %3830 = vmatprep.subr.bf16.mxu0 %v4393_v0  ;;  %3826 = vmatpush3.bf16.msra.mxu1 %v4661_v35 }
  0xb1   :  { %3827 = vmatprep.subr.bf16.mxu1 %v4393_v0 }
  0xb4   :  { %3829 = vmatpush3.bf16.msra.mxu1 %v4665_v38 }
  0xb5   :  { %3836 = vmatprep.subr.bf16.mxu1 %v4393_v0 }
  0xb7   :  { %3526 = vmatmul.mubr.f32.vlgmr.msra.gmra.mrb[2].mxu1 %v4395_v1 }
  0xb8   :  { %3838 = vmatpush3.bf16.msra.mxu1 %v4627_v8  ;;  %3547 = vmatprep.mubr.msk.f32.mxu1 %vm4394_vm0, %v4395_v1 }
  0xb9   :  { %3839 = vmatprep.subr.bf16.mxu1 %v4393_v0 }
  0xbc   :  { %3841 = vmatpush3.bf16.msra.mxu1 %v4634_v12 }
  0xbd   :  { %3848 = vmatprep.subr.bf16.mxu1 %v4393_v0 }
 0x17d   :  { %v3494_v14 = vpop.f32.mrb[0].mxu0 }
 0x17e   :  { %v4650_v15 = vadd.f32 %v3494_v14, %v3301_v13  ;;  %v251_v16 = vpop.f32.mrb[1].mxu0 }
 0x17f   :  { %v4652_v17 = vadd.f32 %v3301_v13, %v251_v16 }
 0x181   :  { %v343_v18 = vpop.f32.mrb[0].mxu1 }
 0x182   :  { %v347_v19 = vadd.f32 %v343_v18, %v4652_v17  ;;  %v3505_v20 = vpop.f32.mrb[1].mxu1 }
 0x184   :  { %4003 = vtanh.f32 %v347_v19  ;;  %v348_v22 = vsub.f32 0.0, %v347_v19 }
 0x186   :  { %v349_v23 = vmul.f32 1.442695, %v348_v22 }
 0x188   :  { %4005 = vpow2.f32 %v349_v23 }
 0x18a   :  { %v544_v48 = vpop.f32.mrb[2].mxu1 }
 0x18b   :  { %v3527_v49 = vpop.f32.mrb[3].mxu1 }
 0x18e   :  { %v4004_v21 = vpop.eup %4003 }
 0x18f   :  { %357 = vrot.lane.b32.xlu0 %v4004_v21, %s4396_s0 }
 0x192   :  { %v4006_v24 = vpop.eup %4005 }
 0x193   :  { %v351_v25 = vadd.f32 1.0, %v4006_v24 }
 0x195   :  { %4007 = vrcp.f32 %v351_v25 }
 0x19f   :  { %v4008_v26 = vpop.eup %4007 }
 0x1a0   :  { %v355_v29 = vmul.f32 0.0, %v4008_v26 }
 0x201   :  { %v358_v27 = vpop.permute.xlu0 %357 }
 0x202   :  { %v360_v28 = vmul.f32 %v4008_v26, %v358_v27 }
 0x204   :  { %362 = vrot.lane.b32.xlu0 %v360_v28, %s4397_s23 }
 0x276   :  { %v363_v30 = vpop.permute.xlu0 %362 }
 0x277   :  { %v4657_v31 = vadd.f32 %v363_v30, %v355_v29 }
 0x279   :  { %4009 = vtanh.f32 %v4657_v31  ;;  %v459_v16 = vrot.slane %v4657_v31, 6 }
 0x283   :  { %v4010_v32 = vpop.eup %4009 }
 0x284   :  { %368 = vrot.lane.b32.xlu1 %v4010_v32, %s4396_s0 }
 0x2f6   :  { %v369_v39 = vpop.permute.xlu1 %368 }
 0x2f7   :  { %v371_v40 = vmul.f32 %v4008_v26, %v369_v39 }
 0x2f9   :  { %373 = vrot.lane.b32.xlu1 %v371_v40, %s4397_s23 }
 0x36b   :  { %v374_v46 = vpop.permute.xlu1 %373 }
 0x36c   :  { %3515 = vmatmul.mubr.msk.f32.vlgmr.msra.gmra.mrb[2].mxu0 %vm273_vm2, %v374_v46 }
 0x36d   :  { %3832 = vmatpush3.bf16.msra.mxu0 %v4677_v43  ;;  %3536 = vmatprep.mubr.msk.f32.mxu0 %vm4394_vm0, %v4395_v1 }
 0x36e   :  { %3833 = vmatprep.subr.bf16.mxu0 %v4393_v0 }
 0x371   :  { %3835 = vmatpush3.bf16.msra.mxu0 %v4681_v47 }
 0x372   :  { %3842 = vmatprep.subr.bf16.mxu0 %v4393_v0 }
 0x374   :  { %3537 = vmatmul.mubr.msk.f32.vlgmr.msra.gmra.mrb[4].mxu0 %vm273_vm2, %v374_v46 }
 0x375   :  { %3844 = vmatpush3.bf16.msra.mxu0 %v4661_v35  ;;  %3558 = vmatprep.mubr.msk.f32.mxu0 %vm4394_vm0, %v4395_v1 }
 0x376   :  { %3845 = vmatprep.subr.bf16.mxu0 %v4393_v0 }
 0x379   :  { %3847 = vmatpush3.bf16.msra.mxu0 %v4665_v38 }
 0x37a   :  { %3854 = vmatprep.subr.bf16.mxu0 %v4393_v0 }
 0x43f   :  { %v443_v50 = vpop.f32.mrb[2].mxu0 }
 0x440   :  { %v448_v51 = vrot.slane %v443_v50, 6  ;;  %v3516_v52 = vpop.f32.mrb[3].mxu0 }
 0x442   :  { %v450_v53 = vadd.f32 %v448_v51, %v4652_v17 }
 0x444   :  { %4011 = vtanh.f32 %v450_v53  ;;  %v451_v61 = vsub.f32 0.0, %v450_v53 }
 0x446   :  { %v452_v62 = vmul.f32 1.442695, %v451_v61 }
 0x447   :  { %v614_v55 = vpop.f32.mrb[4].mxu0 }
 0x448   :  { %v615_v56 = vadd.f32 %v614_v55, %v544_v48  ;;  %v3538_v57 = vpop.f32.mrb[5].mxu0 }
 0x44a   :  { %v624_v58 = vadd.f32 %v4696_v54, %v615_v56 }
 0x44c   :  { %4013 = vtanh.f32 %v624_v58  ;;  %v625_v63 = vsub.f32 0.0, %v624_v58 }
 0x44d   :  { %4015 = vpow2.f32 %v452_v62 }
 0x44e   :  { %v4012_v59 = vpop.eup %4011  ;;  %v626_v2 = vmul.f32 1.442695, %v625_v63 }
 0x44f   :  { %463 = vrot.lane.b32.xlu0 %v4012_v59, %s4396_s0 }
 0x450   :  { %4017 = vpow2.f32 %v626_v2 }
 0x456   :  { %v4014_v60 = vpop.eup %4013 }
 0x457   :  { %634 = vrot.lane.b32.xlu1 %v4014_v60, %s4396_s0  ;;  %v4016_v3 = vpop.eup %4015 }
 0x458   :  { %v454_v4 = vadd.f32 1.0, %v4016_v3 }
 0x45a   :  { %4019 = vrcp.f32 %v454_v4  ;;  %v4018_v5 = vpop.eup %4017 }
 0x45b   :  { %v628_v6 = vadd.f32 1.0, %v4018_v5 }
 0x45d   :  { %4021 = vrcp.f32 %v628_v6 }
 0x464   :  { %v4020_v7 = vpop.eup %4019 }
 0x465   :  { %v461_v18 = vmul.f32 %v4020_v7, %v459_v16 }
 0x467   :  { %v4022_v11 = vpop.eup %4021 }
 0x468   :  { %v632_v21 = vmul.f32 0.0, %v4022_v11 }
 0x4c1   :  { %v464_v9 = vpop.permute.xlu0 %463 }
 0x4c2   :  { %v466_v10 = vmul.f32 %v4020_v7, %v464_v9 }
 0x4c4   :  { %468 = vrot.lane.b32.xlu0 %v466_v10, %s4397_s23 }
 0x4c9   :  { %v635_v13 = vpop.permute.xlu1 %634 }
 0x4ca   :  { %v637_v14 = vmul.f32 %v4022_v11, %v635_v13 }
 0x4cc   :  { %639 = vrot.lane.b32.xlu1 %v637_v14, %s4397_s23 }
 0x536   :  { %v469_v19 = vpop.permute.xlu0 %468 }
 0x537   :  { %v4704_v20 = vadd.f32 %v469_v19, %v461_v18 }
 0x539   :  { %4023 = vtanh.f32 %v4704_v20  ;;  %v737_v2 = vrot.slane %v4704_v20, 6 }
 0x53e   :  { %v640_v22 = vpop.permute.xlu1 %639 }
 0x53f   :  { %v4707_v23 = vadd.f32 %v640_v22, %v632_v21 }
 0x541   :  { %4025 = vtanh.f32 %v4707_v23 }
 0x543   :  { %v4024_v24 = vpop.eup %4023 }
 0x544   :  { %474 = vrot.lane.b32.xlu0 %v4024_v24, %s4396_s0 }
 0x54b   :  { %v4026_v25 = vpop.eup %4025 }
 0x54c   :  { %645 = vrot.lane.b32.xlu1 %v4026_v25, %s4396_s0 }
 0x5b6   :  { %v475_v26 = vpop.permute.xlu0 %474 }
 0x5b7   :  { %v477_v27 = vmul.f32 %v4020_v7, %v475_v26 }
 0x5b9   :  { %v650_v28 = vrot.slane %v477_v27, 2 }
 0x5bb   :  { %651 = vrot.lane.b32.xlu0 %v650_v28, %s4397_s23 }
 0x5be   :  { %v646_v29 = vpop.permute.xlu1 %645 }
 0x5bf   :  { %v4713_v30 = vmul.f32 %v4022_v11, %v646_v29 }
 0x5c1   :  { %757 = vrot.lane.b32.xlu1 %v4713_v30, %s4397_s23 }
 0x62d   :  { %v652_v31 = vpop.permute.xlu0 %651 }
 0x62e   :  { %3548 = vmatmul.mubr.msk.f32.vlgmr.msra.gmra.mrb[4].mxu1 %vm273_vm2, %v652_v31 }
 0x62f   :  { %3850 = vmatpush3.bf16.msra.mxu1 %v4677_v43  ;;  %3569 = vmatprep.mubr.msk.f32.mxu1 %vm4394_vm0, %v4395_v1 }
 0x630   :  { %3851 = vmatprep.subr.bf16.mxu1 %v4393_v0 }
 0x633   :  { %3853 = vmatpush3.bf16.msra.mxu1 %v4681_v47  ;;  %v758_v32 = vpop.permute.xlu1 %757 }
 0x634   :  { %3559 = vmatmul.mubr.msk.f32.vlgmr.msra.gmra.mrb[6].mxu0 %vm273_vm2, %v758_v32  ;;  %3860 = vmatprep.subr.bf16.mxu1 %v4393_v0 }
 0x635   :  { %3856 = vmatpush3.bf16.msra.mxu0 %v4627_v8  ;;  %3580 = vmatprep.mubr.msk.f32.mxu0 %vm4394_vm0, %v4395_v1 }
 0x636   :  { %3570 = vmatmul.mubr.msk.f32.vlgmr.msra.gmra.mrb[6].mxu1 %vm273_vm2, %v652_v31  ;;  %3857 = vmatprep.subr.bf16.mxu0 %v4393_v0 }
 0x637   :  { %3862 = vmatpush3.bf16.msra.mxu1 %v4661_v35  ;;  %3591 = vmatprep.mubr.msk.f32.mxu1 %vm4394_vm0, %v4395_v1 }
 0x638   :  { %3863 = vmatprep.subr.bf16.mxu1 %v4393_v0 }
 0x639   :  { %3859 = vmatpush3.bf16.msra.mxu0 %v4634_v12 }
 0x63a   :  { %3866 = vmatprep.subr.bf16.mxu0 %v4393_v0 }
 0x63b   :  { %3865 = vmatpush3.bf16.msra.mxu1 %v4665_v38 }
 0x63c   :  { %3872 = vmatprep.subr.bf16.mxu1 %v4393_v0 }
 0x701   :  { %v721_v33 = vpop.f32.mrb[4].mxu1 }
 0x702   :  { %v726_v34 = vrot.slane %v721_v33, 4  ;;  %v3549_v36 = vpop.f32.mrb[5].mxu1 }
 0x704   :  { %v728_v37 = vadd.f32 %v726_v34, %v4652_v17 }
 0x706   :  { %4027 = vtanh.f32 %v728_v37  ;;  %v729_v49 = vsub.f32 0.0, %v728_v37 }
 0x707   :  { %v827_v39 = vpop.f32.mrb[6].mxu0 }
 0x708   :  { %v3560_v40 = vpop.f32.mrb[7].mxu0  ;;  %v730_v50 = vmul.f32 1.442695, %v729_v49 }
 0x709   :  { %v897_v41 = vpop.f32.mrb[6].mxu1 }
 0x70a   :  { %v898_v42 = vadd.f32 %v897_v41, %v827_v39  ;;  %v3571_v44 = vpop.f32.mrb[7].mxu1 }
 0x70c   :  { %v901_v45 = vadd.f32 %v4696_v54, %v898_v42 }
 0x70e   :  { %4029 = vtanh.f32 %v901_v45  ;;  %v902_v51 = vsub.f32 0.0, %v901_v45 }
 0x70f   :  { %4031 = vpow2.f32 %v730_v50 }
 0x710   :  { %v4028_v46 = vpop.eup %4027  ;;  %v903_v52 = vmul.f32 1.442695, %v902_v51 }
 0x711   :  { %741 = vrot.lane.b32.xlu0 %v4028_v46, %s4396_s0 }
 0x712   :  { %4033 = vpow2.f32 %v903_v52 }
 0x718   :  { %v4030_v48 = vpop.eup %4029 }
 0x719   :  { %911 = vrot.lane.b32.xlu1 %v4030_v48, %s4396_s0  ;;  %v4032_v53 = vpop.eup %4031 }
 0x71a   :  { %v732_v55 = vadd.f32 1.0, %v4032_v53 }
 0x71c   :  { %4035 = vrcp.f32 %v732_v55  ;;  %v4034_v56 = vpop.eup %4033 }
 0x71d   :  { %v905_v57 = vadd.f32 1.0, %v4034_v56 }
 0x71f   :  { %4037 = vrcp.f32 %v905_v57 }
 0x726   :  { %v4036_v58 = vpop.eup %4035 }
 0x727   :  { %v739_v3 = vmul.f32 %v4036_v58, %v737_v2 }
 0x729   :  { %v4038_v61 = vpop.eup %4037 }
 0x72a   :  { %v909_v6 = vmul.f32 %v4038_v61, %v4707_v23 }
 0x783   :  { %v742_v59 = vpop.permute.xlu0 %741 }
 0x784   :  { %v744_v60 = vmul.f32 %v4036_v58, %v742_v59 }
 0x786   :  { %746 = vrot.lane.b32.xlu0 %v744_v60, %s4397_s23 }
 0x78b   :  { %v912_v62 = vpop.permute.xlu1 %911 }
 0x78c   :  { %v914_v63 = vmul.f32 %v4038_v61, %v912_v62 }
 0x78e   :  { %916 = vrot.lane.b32.xlu1 %v914_v63, %s4397_s23 }
 0x7f8   :  { %v747_v4 = vpop.permute.xlu0 %746 }
 0x7f9   :  { %v4745_v5 = vadd.f32 %v747_v4, %v739_v3 }
 0x7fb   :  { %4039 = vtanh.f32 %v4745_v5  ;;  %v1014_v52 = vrot.slane %v4745_v5, 6 }
 0x800   :  { %v917_v7 = vpop.permute.xlu1 %916 }
 0x801   :  { %v4749_v9 = vadd.f32 %v917_v7, %v909_v6 }
 0x803   :  { %4041 = vtanh.f32 %v4749_v9 }
 0x805   :  { %v4040_v10 = vpop.eup %4039 }
 0x806   :  { %752 = vrot.lane.b32.xlu0 %v4040_v10, %s4396_s0 }
 0x80d   :  { %v4042_v11 = vpop.eup %4041 }
 0x80e   :  { %922 = vrot.lane.b32.xlu1 %v4042_v11, %s4396_s0 }
 0x878   :  { %v753_v13 = vpop.permute.xlu0 %752 }
 0x879   :  { %v755_v14 = vmul.f32 %v4036_v58, %v753_v13 }
 0x87b   :  { %v927_v16 = vrot.slane %v755_v14, 4 }
 0x87d   :  { %928 = vrot.lane.b32.xlu0 %v927_v16, %s4397_s23 }
 0x880   :  { %v923_v18 = vpop.permute.xlu1 %922 }
 0x881   :  { %v4755_v19 = vmul.f32 %v4038_v61, %v923_v18 }
 0x883   :  { %1034 = vrot.lane.b32.xlu1 %v4755_v19, %s4397_s23  ;;  %v2483_v3 = vrot.slane %v4755_v19, 6 }
 0x885   :  { %v2497_v7 = vsel %vm2496_vm3, %v4713_v30, %v2483_v3 }
 0x8ef   :  { %v929_v20 = vpop.permute.xlu0 %928 }
 0x8f0   :  { %3581 = vmatmul.mubr.msk.f32.vlgmr.msra.gmra.mrb[8].mxu0 %vm273_vm2, %v929_v20 }
 0x8f1   :  { %3868 = vmatpush3.bf16.msra.mxu0 %v4677_v43  ;;  %3602 = vmatprep.mubr.msk.f32.mxu0 %vm4394_vm0, %v4395_v1 }
 0x8f2   :  { %3869 = vmatprep.subr.bf16.mxu0 %v4393_v0 }
 0x8f5   :  { %3871 = vmatpush3.bf16.msra.mxu0 %v4681_v47  ;;  %v1035_v21 = vpop.permute.xlu1 %1034 }
 0x8f6   :  { %3592 = vmatmul.mubr.msk.f32.vlgmr.msra.gmra.mrb[8].mxu1 %vm273_vm2, %v1035_v21  ;;  %3878 = vmatprep.subr.bf16.mxu0 %v4393_v0 }
 0x8f7   :  { %3874 = vmatpush3.bf16.msra.mxu1 %v4627_v8  ;;  %3613 = vmatprep.mubr.msk.f32.mxu1 %vm4394_vm0, %v4395_v1 }
 0x8f8   :  { %3603 = vmatmul.mubr.msk.f32.vlgmr.msra.gmra.mrb[10].mxu0 %vm273_vm2, %v929_v20  ;;  %3875 = vmatprep.subr.bf16.mxu1 %v4393_v0 }
 0x8f9   :  { %3880 = vmatpush3.bf16.msra.mxu0 %v4661_v35  ;;  %3624 = vmatprep.mubr.msk.f32.mxu0 %vm4394_vm0, %v4395_v1 }
 0x8fa   :  { %3881 = vmatprep.subr.bf16.mxu0 %v4393_v0 }
 0x8fb   :  { %3877 = vmatpush3.bf16.msra.mxu1 %v4634_v12 }
 0x8fc   :  { %3884 = vmatprep.subr.bf16.mxu1 %v4393_v0 }
 0x8fd   :  { %3883 = vmatpush3.bf16.msra.mxu0 %v4665_v38 }
 0x8fe   :  { %3890 = vmatprep.subr.bf16.mxu0 %v4393_v0 }
 0x9c3   :  { %v998_v22 = vpop.f32.mrb[8].mxu0 }
 0x9c4   :  { %v1003_v23 = vrot.slane %v998_v22, 2  ;;  %v3582_v24 = vpop.f32.mrb[9].mxu0 }
 0x9c6   :  { %v1005_v25 = vadd.f32 %v1003_v23, %v4652_v17 }
 0x9c8   :  { %4043 = vtanh.f32 %v1005_v25  ;;  %v1006_v36 = vsub.f32 0.0, %v1005_v25 }
 0x9c9   :  { %v1104_v26 = vpop.f32.mrb[8].mxu1 }
 0x9ca   :  { %v3593_v27 = vpop.f32.mrb[9].mxu1  ;;  %v1007_v37 = vmul.f32 1.442695, %v1006_v36 }
 0x9cb   :  { %v1174_v28 = vpop.f32.mrb[10].mxu0 }
 0x9cc   :  { %v1175_v29 = vadd.f32 %v1174_v28, %v1104_v26  ;;  %v3604_v31 = vpop.f32.mrb[11].mxu0 }
 0x9ce   :  { %v1178_v32 = vadd.f32 %v4696_v54, %v1175_v29 }
 0x9d0   :  { %4045 = vtanh.f32 %v1178_v32  ;;  %v1179_v39 = vsub.f32 0.0, %v1178_v32 }
 0x9d1   :  { %4047 = vpow2.f32 %v1007_v37 }
 0x9d2   :  { %v4044_v33 = vpop.eup %4043  ;;  %v1180_v17 = vmul.f32 1.442695, %v1179_v39 }
 0x9d3   :  { %1018 = vrot.lane.b32.xlu0 %v4044_v33, %s4396_s0 }
 0x9d4   :  { %4049 = vpow2.f32 %v1180_v17 }
 0x9da   :  { %v4046_v34 = vpop.eup %4045 }
 0x9db   :  { %1188 = vrot.lane.b32.xlu1 %v4046_v34, %s4396_s0  ;;  %v4048_v40 = vpop.eup %4047 }
 0x9dc   :  { %v1009_v41 = vadd.f32 1.0, %v4048_v40 }
 0x9de   :  { %4051 = vrcp.f32 %v1009_v41  ;;  %v4050_v42 = vpop.eup %4049 }
 0x9df   :  { %v1182_v44 = vadd.f32 1.0, %v4050_v42 }
 0x9e1   :  { %4053 = vrcp.f32 %v1182_v44 }
 0x9e8   :  { %v4052_v45 = vpop.eup %4051 }
 0x9e9   :  { %v1016_v53 = vmul.f32 %v4052_v45, %v1014_v52 }
 0x9eb   :  { %v4054_v49 = vpop.eup %4053 }
 0x9ec   :  { %v1186_v57 = vmul.f32 %v4054_v49, %v4749_v9 }
 0xa45   :  { %v1019_v46 = vpop.permute.xlu0 %1018 }
 0xa46   :  { %v1021_v48 = vmul.f32 %v4052_v45, %v1019_v46 }
 0xa48   :  { %1023 = vrot.lane.b32.xlu0 %v1021_v48, %s4397_s23 }
 0xa4d   :  { %v1189_v50 = vpop.permute.xlu1 %1188 }
 0xa4e   :  { %v1191_v51 = vmul.f32 %v4054_v49, %v1189_v50 }
 0xa50   :  { %1193 = vrot.lane.b32.xlu1 %v1191_v51, %s4397_s23 }
 0xaba   :  { %v1024_v55 = vpop.permute.xlu0 %1023 }
 0xabb   :  { %v4787_v56 = vadd.f32 %v1024_v55, %v1016_v53 }
 0xabd   :  { %4055 = vtanh.f32 %v4787_v56  ;;  %v1288_v41 = vrot.slane %v4787_v56, 6 }
 0xac2   :  { %v1194_v58 = vpop.permute.xlu1 %1193 }
 0xac3   :  { %v4791_v59 = vadd.f32 %v1194_v58, %v1186_v57 }
 0xac5   :  { %4057 = vtanh.f32 %v4791_v59 }
 0xac7   :  { %v4056_v60 = vpop.eup %4055 }
 0xac8   :  { %1029 = vrot.lane.b32.xlu0 %v4056_v60, %s4396_s0 }
 0xacf   :  { %v4058_v61 = vpop.eup %4057 }
 0xad0   :  { %1199 = vrot.lane.b32.xlu1 %v4058_v61, %s4396_s0 }
 0xb3a   :  { %v1030_v62 = vpop.permute.xlu0 %1029 }
 0xb3b   :  { %v1032_v63 = vmul.f32 %v4052_v45, %v1030_v62 }
 0xb3d   :  { %v1204_v2 = vrot.slane %v1032_v63, 6 }
 0xb3f   :  { %1205 = vrot.lane.b32.xlu0 %v1204_v2, %s4397_s23 }
 0xb42   :  { %v1200_v4 = vpop.permute.xlu1 %1199 }
 0xb43   :  { %v1202_v5 = vmul.f32 %v4054_v49, %v1200_v4 }
 0xb45   :  { %v2485_v6 = vrot.slane %v1202_v5, 4  ;;  %1308 = vrot.lane.b32.xlu1 %v1202_v5, %s4397_s23 }
 0xb47   :  { %v4802_v9 = vsel %vm2498_vm4, %v2497_v7, %v2485_v6 }
 0xbb1   :  { %v1206_v10 = vpop.permute.xlu0 %1205 }
 0xbb2   :  { %3614 = vmatmul.mubr.msk.f32.vlgmr.msra.gmra.mrb[10].mxu1 %vm273_vm2, %v1206_v10 }
 0xbb3   :  { %3886 = vmatpush3.bf16.msra.mxu1 %v4677_v43  ;;  %3635 = vmatprep.mubr.msk.f32.mxu1 %vm4394_vm0, %v4395_v1 }
 0xbb4   :  { %3887 = vmatprep.subr.bf16.mxu1 %v4393_v0 }
 0xbb7   :  { %3889 = vmatpush3.bf16.msra.mxu1 %v4681_v47  ;;  %v1309_v11 = vpop.permute.xlu1 %1308 }
 0xbb8   :  { %3625 = vmatmul.mubr.msk.f32.vlgmr.msra.gmra.mrb[12].mxu0 %vm273_vm2, %v1309_v11  ;;  %3896 = vmatprep.subr.bf16.mxu1 %v4393_v0 }
 0xbb9   :  { %3892 = vmatpush3.bf16.msra.mxu0 %v4627_v8  ;;  %3646 = vmatprep.mubr.msk.f32.mxu0 %vm4394_vm0, %v4395_v1 }
 0xbba   :  { %3636 = vmatmul.mubr.msk.f32.vlgmr.msra.gmra.mrb[12].mxu1 %vm273_vm2, %v1206_v10  ;;  %3893 = vmatprep.subr.bf16.mxu0 %v4393_v0 }
 0xbbb   :  { %3898 = vmatpush3.bf16.msra.mxu1 %v4661_v35  ;;  %3657 = vmatprep.mubr.msk.f32.mxu1 %vm4394_vm0, %v4395_v1 }
 0xbbc   :  { %3899 = vmatprep.subr.bf16.mxu1 %v4393_v0 }
 0xbbd   :  { %3895 = vmatpush3.bf16.msra.mxu0 %v4634_v12 }
 0xbbe   :  { %3902 = vmatprep.subr.bf16.mxu0 %v4393_v0 }
 0xbbf   :  { %3901 = vmatpush3.bf16.msra.mxu1 %v4665_v38 }
 0xbc0   :  { %3908 = vmatprep.subr.bf16.mxu1 %v4393_v0 }
 0xc85   :  { %v1275_v30 = vpop.f32.mrb[10].mxu1 }
 0xc86   :  { %v1279_v13 = vadd.f32 %v1275_v30, %v4650_v15  ;;  %v3615_v14 = vpop.f32.mrb[11].mxu1 }
 0xc88   :  { %4059 = vtanh.f32 %v1279_v13  ;;  %v1280_v25 = vsub.f32 0.0, %v1279_v13 }
 0xc8a   :  { %v1281_v26 = vmul.f32 1.442695, %v1280_v25 }
 0xc8b   :  { %v1378_v16 = vpop.f32.mrb[12].mxu0 }
 0xc8c   :  { %v3626_v18 = vpop.f32.mrb[13].mxu0 }
 0xc8d   :  { %v1448_v19 = vpop.f32.mrb[12].mxu1 }
 0xc8e   :  { %v1449_v20 = vadd.f32 %v1448_v19, %v1378_v16  ;;  %v3637_v21 = vpop.f32.mrb[13].mxu1 }
 0xc90   :  { %v1452_v22 = vadd.f32 %v4696_v54, %v1449_v20 }
 0xc92   :  { %v4060_v23 = vpop.eup %4059  ;;  %4061 = vtanh.f32 %v1452_v22  ;;  %v1453_v27 = vsub.f32 0.0, %v1452_v22 }
 0xc93   :  { %1292 = vrot.lane.b32.xlu0 %v4060_v23, %s4396_s0  ;;  %4063 = vpow2.f32 %v1281_v26 }
 0xc94   :  { %v1454_v28 = vmul.f32 1.442695, %v1453_v27 }
 0xc96   :  { %4065 = vpow2.f32 %v1454_v28 }
 0xc9c   :  { %v4062_v24 = vpop.eup %4061 }
 0xc9d   :  { %1462 = vrot.lane.b32.xlu1 %v4062_v24, %s4396_s0  ;;  %v4064_v29 = vpop.eup %4063 }
 0xc9e   :  { %v1283_v31 = vadd.f32 1.0, %v4064_v29 }
 0xca0   :  { %4067 = vrcp.f32 %v1283_v31  ;;  %v4066_v32 = vpop.eup %4065 }
 0xca1   :  { %v1456_v33 = vadd.f32 1.0, %v4066_v32 }
 0xca3   :  { %4069 = vrcp.f32 %v1456_v33 }
 0xcaa   :  { %v4068_v34 = vpop.eup %4067 }
 0xcab   :  { %v1290_v42 = vmul.f32 %v4068_v34, %v1288_v41 }
 0xcad   :  { %v4070_v39 = vpop.eup %4069 }
 0xcae   :  { %v1460_v46 = vmul.f32 %v4070_v39, %v4791_v59 }
 0xd05   :  { %v1293_v36 = vpop.permute.xlu0 %1292 }
 0xd06   :  { %v1295_v37 = vmul.f32 %v4068_v34, %v1293_v36 }
 0xd08   :  { %1297 = vrot.lane.b32.xlu0 %v1295_v37, %s4397_s23 }
 0xd0f   :  { %v1463_v17 = vpop.permute.xlu1 %1462 }
 0xd10   :  { %v1465_v40 = vmul.f32 %v4070_v39, %v1463_v17 }
 0xd12   :  { %1467 = vrot.lane.b32.xlu1 %v1465_v40, %s4397_s23 }
 0xd7a   :  { %v1298_v44 = vpop.permute.xlu0 %1297 }
 0xd7b   :  { %v4832_v45 = vadd.f32 %v1298_v44, %v1290_v42 }
 0xd7d   :  { %4071 = vtanh.f32 %v4832_v45  ;;  %v1564_v28 = vrot.slane %v4832_v45, 6 }
 0xd84   :  { %v1468_v48 = vpop.permute.xlu1 %1467 }
 0xd85   :  { %v4836_v49 = vadd.f32 %v1468_v48, %v1460_v46 }
 0xd87   :  { %v4072_v50 = vpop.eup %4071  ;;  %4073 = vtanh.f32 %v4836_v49 }
 0xd88   :  { %1303 = vrot.lane.b32.xlu0 %v4072_v50, %s4396_s0 }
 0xd91   :  { %v4074_v51 = vpop.eup %4073 }
 0xd92   :  { %1473 = vrot.lane.b32.xlu1 %v4074_v51, %s4396_s0 }
 0xdfa   :  { %v1304_v52 = vpop.permute.xlu0 %1303 }
 0xdfb   :  { %v1306_v53 = vmul.f32 %v4068_v34, %v1304_v52 }
 0xdfd   :  { %1478 = vrot.lane.b32.xlu0 %v1306_v53, %s4397_s23 }
 0xe04   :  { %v1474_v55 = vpop.permute.xlu1 %1473 }
 0xe05   :  { %v1476_v56 = vmul.f32 %v4070_v39, %v1474_v55 }
 0xe07   :  { %v2487_v57 = vrot.slane %v1476_v56, 2  ;;  %1584 = vrot.lane.b32.xlu1 %v1476_v56, %s4397_s23 }
 0xe09   :  { %v4845_v58 = vsel %vm2500_vm5, %v4802_v9, %v2487_v57 }
 0xe6f   :  { %v1479_v59 = vpop.permute.xlu0 %1478 }
 0xe70   :  { %3647 = vmatmul.mubr.msk.f32.vlgmr.msra.gmra.mrb[14].mxu0 %vm273_vm2, %v1479_v59 }
 0xe71   :  { %3904 = vmatpush3.bf16.msra.mxu0 %v4677_v43  ;;  %3668 = vmatprep.mubr.msk.f32.mxu0 %vm4394_vm0, %v4395_v1 }
 0xe72   :  { %3905 = vmatprep.subr.bf16.mxu0 %v4393_v0 }
 0xe75   :  { %3907 = vmatpush3.bf16.msra.mxu0 %v4681_v47 }
 0xe76   :  { %3914 = vmatprep.subr.bf16.mxu0 %v4393_v0 }
 0xe78   :  { %3669 = vmatmul.mubr.msk.f32.vlgmr.msra.gmra.mrb[16].mxu0 %vm273_vm2, %v1479_v59 }
 0xe79   :  { %v1585_v60 = vpop.permute.xlu1 %1584  ;;  %3916 = vmatpush3.bf16.msra.mxu0 %v4661_v35  ;;  %3690 = vmatprep.mubr.msk.f32.mxu0 %vm4394_vm0, %v4395_v1 }
 0xe7a   :  { %3658 = vmatmul.mubr.msk.f32.vlgmr.msra.gmra.mrb[14].mxu1 %vm273_vm2, %v1585_v60  ;;  %3917 = vmatprep.subr.bf16.mxu0 %v4393_v0 }
 0xe7b   :  { %3910 = vmatpush3.bf16.msra.mxu1 %v4627_v8  ;;  %3679 = vmatprep.mubr.msk.f32.mxu1 %vm4394_vm0, %v4395_v1 }
 0xe7c   :  { %3911 = vmatprep.subr.bf16.mxu1 %v4393_v0 }
 0xe7d   :  { %3919 = vmatpush3.bf16.msra.mxu0 %v4665_v38 }
 0xe7e   :  { %3926 = vmatprep.subr.bf16.mxu0 %v4393_v0 }
 0xe7f   :  { %3913 = vmatpush3.bf16.msra.mxu1 %v4634_v12 }
 0xe80   :  { %3920 = vmatprep.subr.bf16.mxu1 %v4393_v0 }
 0xf43   :  { %v1548_v61 = vpop.f32.mrb[14].mxu0 }
 0xf44   :  { %v1553_v62 = vrot.slane %v1548_v61, 6  ;;  %v3648_v63 = vpop.f32.mrb[15].mxu0 }
 0xf46   :  { %v1555_v2 = vadd.f32 %v1553_v62, %v4650_v15 }
 0xf48   :  { %4075 = vtanh.f32 %v1555_v2  ;;  %v1556_v30 = vsub.f32 0.0, %v1555_v2 }
 0xf4a   :  { %v1557_v13 = vmul.f32 1.442695, %v1556_v30 }
 0xf4b   :  { %v1724_v3 = vpop.f32.mrb[16].mxu0 }
 0xf4c   :  { %v3670_v4 = vpop.f32.mrb[17].mxu0 }
 0xf4d   :  { %v1654_v5 = vpop.f32.mrb[14].mxu1 }
 0xf4e   :  { %v1725_v6 = vadd.f32 %v1724_v3, %v1654_v5  ;;  %v3659_v7 = vpop.f32.mrb[15].mxu1 }
 0xf50   :  { %v1728_v9 = vadd.f32 %v4696_v54, %v1725_v6 }
 0xf52   :  { %v4076_v10 = vpop.eup %4075  ;;  %4077 = vtanh.f32 %v1728_v9  ;;  %v1729_v14 = vsub.f32 0.0, %v1728_v9 }
 0xf53   :  { %1568 = vrot.lane.b32.xlu0 %v4076_v10, %s4396_s0  ;;  %4079 = vpow2.f32 %v1557_v13 }
 0xf54   :  { %v1730_v16 = vmul.f32 1.442695, %v1729_v14 }
 0xf56   :  { %4081 = vpow2.f32 %v1730_v16 }
 0xf5c   :  { %v4078_v11 = vpop.eup %4077 }
 0xf5d   :  { %1738 = vrot.lane.b32.xlu1 %v4078_v11, %s4396_s0  ;;  %v4080_v18 = vpop.eup %4079 }
 0xf5e   :  { %v1559_v19 = vadd.f32 1.0, %v4080_v18 }
 0xf60   :  { %4083 = vrcp.f32 %v1559_v19  ;;  %v4082_v20 = vpop.eup %4081 }
 0xf61   :  { %v1732_v21 = vadd.f32 1.0, %v4082_v20 }
 0xf63   :  { %4085 = vrcp.f32 %v1732_v21 }
 0xf6a   :  { %v4084_v22 = vpop.eup %4083 }
 0xf6b   :  { %v1566_v29 = vmul.f32 %v4084_v22, %v1564_v28 }
 0xf6d   :  { %v4086_v25 = vpop.eup %4085 }
 0xf6e   :  { %v1736_v33 = vmul.f32 %v4086_v25, %v4836_v49 }
 0xfc5   :  { %v1569_v23 = vpop.permute.xlu0 %1568 }
 0xfc6   :  { %v1571_v24 = vmul.f32 %v4084_v22, %v1569_v23 }
 0xfc8   :  { %1573 = vrot.lane.b32.xlu0 %v1571_v24, %s4397_s23 }
 0xfcf   :  { %v1739_v26 = vpop.permute.xlu1 %1738 }
 0xfd0   :  { %v1741_v27 = vmul.f32 %v4086_v25, %v1739_v26 }
 0xfd2   :  { %1743 = vrot.lane.b32.xlu1 %v1741_v27, %s4397_s23 }
0x103a   :  { %v1574_v31 = vpop.permute.xlu0 %1573 }
0x103b   :  { %v4875_v32 = vadd.f32 %v1574_v31, %v1566_v29 }
0x103d   :  { %4087 = vtanh.f32 %v4875_v32  ;;  %v1841_v13 = vrot.slane %v4875_v32, 6 }
0x1044   :  { %v1744_v34 = vpop.permute.xlu1 %1743 }
0x1045   :  { %v4879_v36 = vadd.f32 %v1744_v34, %v1736_v33 }
0x1047   :  { %v4088_v37 = vpop.eup %4087  ;;  %4089 = vtanh.f32 %v4879_v36 }
0x1048   :  { %1579 = vrot.lane.b32.xlu0 %v4088_v37, %s4396_s0 }
0x1051   :  { %v4090_v39 = vpop.eup %4089 }
0x1052   :  { %1749 = vrot.lane.b32.xlu1 %v4090_v39, %s4396_s0 }
0x10ba   :  { %v1580_v17 = vpop.permute.xlu0 %1579 }
0x10bb   :  { %v1582_v40 = vmul.f32 %v4084_v22, %v1580_v17 }
0x10bd   :  { %v1754_v41 = vrot.slane %v1582_v40, 2 }
0x10bf   :  { %1755 = vrot.lane.b32.xlu0 %v1754_v41, %s4397_s23 }
0x10c4   :  { %v1750_v42 = vpop.permute.xlu1 %1749 }
0x10c5   :  { %v4885_v44 = vmul.f32 %v4086_v25, %v1750_v42 }
0x10c7   :  { %1861 = vrot.lane.b32.xlu1 %v4885_v44, %s4397_s23 }
0x1131   :  { %v1756_v45 = vpop.permute.xlu0 %1755 }
0x1132   :  { %3680 = vmatmul.mubr.msk.f32.vlgmr.msra.gmra.mrb[16].mxu1 %vm273_vm2, %v1756_v45 }
0x1133   :  { %3922 = vmatpush3.bf16.msra.mxu1 %v4677_v43  ;;  %3701 = vmatprep.mubr.msk.f32.mxu1 %vm4394_vm0, %v4395_v1 }
0x1134   :  { %3923 = vmatprep.subr.bf16.mxu1 %v4393_v0 }
0x1137   :  { %3925 = vmatpush3.bf16.msra.mxu1 %v4681_v47 }
0x1138   :  { %3932 = vmatprep.subr.bf16.mxu1 %v4393_v0 }
0x1139   :  { %v1862_v46 = vpop.permute.xlu1 %1861 }
0x113a   :  { %3691 = vmatmul.mubr.msk.f32.vlgmr.msra.gmra.mrb[18].mxu0 %vm273_vm2, %v1862_v46  ;;  %3702 = vmatmul.mubr.msk.f32.vlgmr.msra.gmra.mrb[18].mxu1 %vm273_vm2, %v1756_v45 }
0x113b   :  { %3928 = vmatpush3.bf16.msra.mxu0 %v4627_v8  ;;  %3934 = vmatpush3.bf16.msra.mxu1 %v4661_v35 }
0x113c   :  { %3929 = vmatprep.subr.bf16.mxu0 %v4393_v0  ;;  %3712 = vmatprep.mubr.msk.f32.mxu0 %vm4394_vm0, %v4395_v1 }
0x113d   :  { %3935 = vmatprep.subr.bf16.mxu1 %v4393_v0  ;;  %3723 = vmatprep.mubr.msk.f32.mxu1 %vm4394_vm0, %v4395_v1 }
0x113f   :  { %3931 = vmatpush3.bf16.msra.mxu0 %v4634_v12  ;;  %3937 = vmatpush3.bf16.msra.mxu1 %v4665_v38 }
0x1140   :  { %3938 = vmatprep.subr.bf16.mxu0 %v4393_v0  ;;  %3944 = vmatprep.subr.bf16.mxu1 %v4393_v0 }
0x1205   :  { %v1825_v8 = vpop.f32.mrb[16].mxu1 }
0x1206   :  { %v1830_v48 = vrot.slane %v1825_v8, 4  ;;  %v3681_v49 = vpop.f32.mrb[17].mxu1 }
0x1208   :  { %v1832_v50 = vadd.f32 %v1830_v48, %v4650_v15 }
0x120a   :  { %4091 = vtanh.f32 %v1832_v50  ;;  %v1833_v60 = vsub.f32 0.0, %v1832_v50 }
0x120c   :  { %v1834_v61 = vmul.f32 1.442695, %v1833_v60 }
0x120d   :  { %v1931_v51 = vpop.f32.mrb[18].mxu0  ;;  %v2001_v52 = vpop.f32.mrb[18].mxu1 }
0x120e   :  { %v2002_v53 = vadd.f32 %v2001_v52, %v1931_v51  ;;  %v3692_v55 = vpop.f32.mrb[19].mxu0  ;;  %v3703_v56 = vpop.f32.mrb[19].mxu1 }
0x1210   :  { %v2005_v57 = vadd.f32 %v4696_v54, %v2002_v53 }
0x1212   :  { %4093 = vtanh.f32 %v2005_v57  ;;  %v2006_v62 = vsub.f32 0.0, %v2005_v57 }
0x1213   :  { %4095 = vpow2.f32 %v1834_v61 }
0x1214   :  { %v4092_v12 = vpop.eup %4091  ;;  %v2007_v63 = vmul.f32 1.442695, %v2006_v62 }
0x1215   :  { %1845 = vrot.lane.b32.xlu0 %v4092_v12, %s4396_s0 }
0x1216   :  { %4097 = vpow2.f32 %v2007_v63 }
0x121c   :  { %v4094_v59 = vpop.eup %4093 }
0x121d   :  { %2015 = vrot.lane.b32.xlu1 %v4094_v59, %s4396_s0  ;;  %v4096_v2 = vpop.eup %4095 }
0x121e   :  { %v1836_v3 = vadd.f32 1.0, %v4096_v2 }
0x1220   :  { %4099 = vrcp.f32 %v1836_v3  ;;  %v4098_v4 = vpop.eup %4097 }
0x1221   :  { %v2009_v5 = vadd.f32 1.0, %v4098_v4 }
0x1223   :  { %4101 = vrcp.f32 %v2009_v5 }
0x122a   :  { %v4100_v6 = vpop.eup %4099 }
0x122b   :  { %v1843_v14 = vmul.f32 %v4100_v6, %v1841_v13 }
0x122d   :  { %v4102_v10 = vpop.eup %4101 }
0x122e   :  { %v2013_v19 = vmul.f32 %v4102_v10, %v4879_v36 }
0x1287   :  { %v1846_v7 = vpop.permute.xlu0 %1845 }
0x1288   :  { %v1848_v9 = vmul.f32 %v4100_v6, %v1846_v7 }
0x128a   :  { %1850 = vrot.lane.b32.xlu0 %v1848_v9, %s4397_s23 }
0x128f   :  { %v2016_v11 = vpop.permute.xlu1 %2015 }
0x1290   :  { %v2018_v30 = vmul.f32 %v4102_v10, %v2016_v11 }
0x1292   :  { %2020 = vrot.lane.b32.xlu1 %v2018_v30, %s4397_s23 }
0x12fc   :  { %v1851_v16 = vpop.permute.xlu0 %1850 }
0x12fd   :  { %v4917_v18 = vadd.f32 %v1851_v16, %v1843_v14 }
0x12ff   :  { %4103 = vtanh.f32 %v4917_v18  ;;  %v2118_v56 = vrot.slane %v4917_v18, 6 }
0x1304   :  { %v2021_v20 = vpop.permute.xlu1 %2020 }
0x1305   :  { %v4921_v21 = vadd.f32 %v2021_v20, %v2013_v19 }
0x1307   :  { %4105 = vtanh.f32 %v4921_v21 }
0x1309   :  { %v4104_v22 = vpop.eup %4103 }
0x130a   :  { %1856 = vrot.lane.b32.xlu0 %v4104_v22, %s4396_s0  ;;  %v4149_v22 = vld [vmem:[#allocation11] ss:$0 sm:$0xff] }
0x1311   :  { %v4106_v23 = vpop.eup %4105 }
0x1312   :  { %2026 = vrot.lane.b32.xlu1 %v4106_v23, %s4396_s0 }
0x137c   :  { %v1857_v24 = vpop.permute.xlu0 %1856 }
0x137d   :  { %v1859_v25 = vmul.f32 %v4100_v6, %v1857_v24 }
0x137f   :  { %v2031_v26 = vrot.slane %v1859_v25, 4 }
0x1381   :  { %2032 = vrot.lane.b32.xlu0 %v2031_v26, %s4397_s23 }
0x1384   :  { %v2027_v27 = vpop.permute.xlu1 %2026 }
0x1385   :  { %v4927_v28 = vmul.f32 %v4102_v10, %v2027_v27 }
0x1387   :  { %2138 = vrot.lane.b32.xlu1 %v4927_v28, %s4397_s23  ;;  %v2489_v6 = vrot.slane %v4927_v28, 6 }
0x1389   :  { %v2502_v11 = vsel %vm2496_vm3, %v4885_v44, %v2489_v6 }
0x13f3   :  { %v2033_v29 = vpop.permute.xlu0 %2032 }
0x13f4   :  { %3713 = vmatmul.mubr.msk.f32.vlgmr.msra.gmra.mrb[20].mxu0 %vm273_vm2, %v2033_v29 }
0x13f5   :  { %3940 = vmatpush3.bf16.msra.mxu0 %v4677_v43  ;;  %3734 = vmatprep.mubr.msk.f32.mxu0 %vm4394_vm0, %v4395_v1 }
0x13f6   :  { %3941 = vmatprep.subr.bf16.mxu0 %v4393_v0 }
0x13f9   :  { %3943 = vmatpush3.bf16.msra.mxu0 %v4681_v47  ;;  %v2139_v31 = vpop.permute.xlu1 %2138 }
0x13fa   :  { %3724 = vmatmul.mubr.msk.f32.vlgmr.msra.gmra.mrb[20].mxu1 %vm273_vm2, %v2139_v31  ;;  %3950 = vmatprep.subr.bf16.mxu0 %v4393_v0 }
0x13fb   :  { %3946 = vmatpush3.bf16.msra.mxu1 %v4661_v35  ;;  %3745 = vmatprep.mubr.msk.f32.mxu1 %vm4394_vm0, %v4395_v1 }
0x13fc   :  { %3735 = vmatmul.mubr.msk.f32.vlgmr.msra.gmra.mrb[22].mxu0 %vm273_vm2, %v2033_v29  ;;  %3947 = vmatprep.subr.bf16.mxu1 %v4393_v0 }
0x13fd   :  { %3952 = vmatpush3.bf16.msra.mxu0 %v4677_v43  ;;  %3756 = vmatprep.mubr.msk.f32.mxu0 %vm4394_vm0, %v4395_v1 }
0x13fe   :  { %3953 = vmatprep.subr.bf16.mxu0 %v4393_v0 }
0x13ff   :  { %3949 = vmatpush3.bf16.msra.mxu1 %v4665_v38 }
0x1401   :  { %3955 = vmatpush3.bf16.msra.mxu0 %v4681_v47 }
0x14c7   :  { %v2102_v32 = vpop.f32.mrb[20].mxu0 }
0x14c8   :  { %v2107_v35 = vrot.slane %v2102_v32, 2  ;;  %v3714_v33 = vpop.f32.mrb[21].mxu0 }
0x14ca   :  { %v2109_v34 = vadd.f32 %v2107_v35, %v4650_v15 }
0x14cc   :  { %4107 = vtanh.f32 %v2109_v34  ;;  %v2110_v47 = vsub.f32 0.0, %v2109_v34 }
0x14cd   :  { %v2208_v36 = vpop.f32.mrb[20].mxu1 }
0x14ce   :  { %v3725_v37 = vpop.f32.mrb[21].mxu1  ;;  %v2111_v42 = vmul.f32 1.442695, %v2110_v47 }
0x14cf   :  { %v2278_v39 = vpop.f32.mrb[22].mxu0  ;;  %v2506_v37 = vld [vmem:[#allocation13 + $0x8] sm:$0xff] }
0x14d0   :  { %v2279_v17 = vadd.f32 %v2278_v39, %v2208_v36  ;;  %v3736_v43 = vpop.f32.mrb[23].mxu0  ;;  %v2505_v36 = vld [vmem:[#allocation13] sm:$0xff]  ;;  %v2507_v39 = vld [vmem:[#allocation13 + $0x10] sm:$0xff] }
0x14d1   :  { %v2508_v43 = vld [vmem:[#allocation13 + $0x18] sm:$0xff] }
0x14d2   :  { %v2282_v40 = vadd.f32 %v4696_v54, %v2279_v17  ;;  %v3956_v17 = vpack.c.bf16 %v2506_v37, %v2505_v36 }
0x14d4   :  { %4109 = vtanh.f32 %v2282_v40  ;;  %v2283_v45 = vsub.f32 0.0, %v2282_v40  ;;  %v3960_v40 = vpack.c.bf16 %v2508_v43, %v2507_v39  ;;  %3957 = vmatprep.subr.bf16.mxu1 %v3956_v17 }
0x14d5   :  { %4111 = vpow2.f32 %v2111_v42 }
0x14d6   :  { %v4108_v41 = vpop.eup %4107  ;;  %v2284_v15 = vmul.f32 1.442695, %v2283_v45 }
0x14d7   :  { %2122 = vrot.lane.b32.xlu0 %v4108_v41, %s4396_s0 }
0x14d8   :  { %4113 = vpow2.f32 %v2284_v15  ;;  %v4398_v15 = vmov 1983009808  }
0x14de   :  { %v4110_v38 = vpop.eup %4109 }
0x14df   :  { %2292 = vrot.lane.b32.xlu1 %v4110_v38, %s4396_s0  ;;  %v4112_v46 = vpop.eup %4111 }
0x14e0   :  { %v2113_v8 = vadd.f32 1.0, %v4112_v46  ;;  %v2605_v46 = vunpack.c.l.s4 %v4398_v15 }
0x14e2   :  { %4115 = vrcp.f32 %v2113_v8  ;;  %v4114_v48 = vpop.eup %4113  ;;  %v2607_v8 = vlaneseq }
0x14e3   :  { %v2286_v49 = vadd.f32 1.0, %v4114_v48  ;;  %v3327_v48 = vld [vmem:[#allocation14] ss:$0 sm:$0xff] }
0x14e5   :  { %4117 = vrcp.f32 %v2286_v49  ;;  %v2606_v49 = vunpack.c.0.s8 %v2605_v46 }
0x14ec   :  { %v4116_v54 = vpop.eup %4115 }
0x14ed   :  { %v2120_v57 = vmul.f32 %v4116_v54, %v2118_v56 }
0x14ef   :  { %v4118_v52 = vpop.eup %4117 }
0x14f0   :  { %v2290_v60 = vmul.f32 %v4118_v52, %v4921_v21 }
0x1549   :  { %v2123_v50 = vpop.permute.xlu0 %2122 }
0x154a   :  { %v2125_v51 = vmul.f32 %v4116_v54, %v2123_v50 }
0x154c   :  { %2127 = vrot.lane.b32.xlu0 %v2125_v51, %s4397_s23 }
0x1551   :  { %v2293_v53 = vpop.permute.xlu1 %2292 }
0x1552   :  { %v2295_v55 = vmul.f32 %v4118_v52, %v2293_v53 }
0x1554   :  { %2297 = vrot.lane.b32.xlu1 %v2295_v55, %s4397_s23 }
0x15be   :  { %v2128_v12 = vpop.permute.xlu0 %2127 }
0x15bf   :  { %v2130_v59 = vadd.f32 %v2128_v12, %v2120_v57 }
0x15c1   :  { %4119 = vtanh.f32 %v2130_v59 }
0x15c6   :  { %v2298_v61 = vpop.permute.xlu1 %2297 }
0x15c7   :  { %v2300_v62 = vadd.f32 %v2298_v61, %v2290_v60  ;;  %v2658_v60 = vld [vmem:[#allocation16] sm:$0xff]  ;;  %v2659_v61 = vld [vmem:[#allocation16 + $0x8] sm:$0xff] }
0x15c9   :  { %4121 = vtanh.f32 %v2300_v62 }
0x15cb   :  { %v4120_v63 = vpop.eup %4119 }
0x15cc   :  { %2133 = vrot.lane.b32.xlu0 %v4120_v63, %s4396_s0  ;;  %v3964_v63 = vpack.c.bf16 %v2659_v61, %v2658_v60 }
0x15ce   :  { %3965 = vmatprep.subr.bf16.mxu0 %v3964_v63 }
0x15d3   :  { %v4122_v2 = vpop.eup %4121 }
0x15d4   :  { %2303 = vrot.lane.b32.xlu1 %v4122_v2, %s4396_s0  ;;  %v2661_v2 = vld [vmem:[#allocation16 + $0x18] sm:$0xff] }
0x163e   :  { %v2134_v3 = vpop.permute.xlu0 %2133 }
0x163f   :  { %v2136_v4 = vmul.f32 %v4116_v54, %v2134_v3  ;;  %v2608_v54 = vshrl.u32 %v2607_v8, 7 }
0x1641   :  { %v2383_v5 = vrot.slane %v2136_v4, 6  ;;  %v4977_v55 = vsub.s32 %v2606_v49, %v2608_v54 }
0x1643   :  { %2384 = vrot.lane.b32.xlu1 %v2383_v5, %s4397_s23 }
0x1646   :  { %v2304_v7 = vpop.permute.xlu1 %2303 }
0x1647   :  { %v2306_v9 = vmul.f32 %v4118_v52, %v2304_v7 }
0x1649   :  { %v2491_v10 = vrot.slane %v2306_v9, 4  ;;  %2308 = vrot.lane.b32.xlu0 %v2306_v9, %s4397_s23 }
0x164b   :  { %v2503_v30 = vsel %vm2498_vm4, %v2502_v11, %v2491_v10 }
0x16b5   :  { %v2385_v13 = vpop.permute.xlu1 %2384 }
0x16b6   :  { %3757 = vmatmul.mubr.msk.f32.vlgmr.msra.gmra.mrb[24].mxu0 %vm273_vm2, %v2385_v13 }
0x16b7   :  { %3967 = vmatpush3.bf16.msra.mxu0 %v3964_v63 }
0x16bb   :  { %v2309_v14 = vpop.permute.xlu0 %2308 }
0x16bc   :  { %3746 = vmatmul.mubr.msk.f32.vlgmr.msra.gmra.mrb[22].mxu1 %vm273_vm2, %v2309_v14 }
0x16bd   :  { %3959 = vmatpush3.bf16.msra.mxu1 %v3956_v17 }
0x16be   :  { %3961 = vmatprep.subr.bf16.mxu1 %v3960_v40 }
0x16c1   :  { %3963 = vmatpush3.bf16.msra.mxu1 %v3960_v40 }
0x1789   :  { %v2454_v16 = vpop.f32.mrb[24].mxu0 }
0x178a   :  { %v3758_v18 = vpop.f32.mrb[25].mxu0 }
0x178f   :  { %v2378_v19 = vpop.f32.mrb[22].mxu1 }
0x1790   :  { %v2455_v20 = vadd.f32 %v2454_v16, %v2378_v19  ;;  %v3747_v21 = vpop.f32.mrb[23].mxu1 }
0x1792   :  { %v2458_v23 = vadd.f32 %v4149_v22, %v2455_v20 }
0x1794   :  { %4123 = vtanh.f32 %v2458_v23  ;;  %v2459_v44 = vsub.f32 0.0, %v2458_v23 }
0x1796   :  { %v2460_v25 = vmul.f32 1.442695, %v2459_v44 }
0x1798   :  { %4125 = vpow2.f32 %v2460_v25 }
0x179e   :  { %v4124_v24 = vpop.eup %4123 }
0x179f   :  { %2468 = vrot.lane.b32.xlu0 %v4124_v24, %s4396_s0 }
0x17a2   :  { %v4126_v26 = vpop.eup %4125 }
0x17a3   :  { %v2462_v27 = vadd.f32 1.0, %v4126_v26 }
0x17a5   :  { %4127 = vrcp.f32 %v2462_v27 }
0x17af   :  { %v4128_v28 = vpop.eup %4127 }
0x17b0   :  { %v2466_v32 = vmul.f32 %v4128_v28, %v2300_v62  ;;  %v2660_v62 = vld [vmem:[#allocation16 + $0x10] sm:$0xff] }
0x17b1   :  { %v3968_v3 = vpack.c.bf16 %v2661_v2, %v2660_v62 }
0x17b3   :  { %3969 = vmatprep.subr.bf16.mxu0 %v3968_v3 }
0x17b4   :  { %3971 = vmatpush3.bf16.msra.mxu0 %v3968_v3 }
0x17b5   :  { %3972 = vmatprep.subr.bf16.mxu0 %v4393_v0 }
0x1811   :  { %v2469_v29 = vpop.permute.xlu0 %2468 }
0x1812   :  { %v2471_v31 = vmul.f32 %v4128_v28, %v2469_v29 }
0x1814   :  { %2473 = vrot.lane.b32.xlu1 %v2471_v31, %s4397_s23 }
0x1818   :  { %2518 = vrot.lane.b32.xlu1 %v4845_v58, %s4397_s23 }
0x1886   :  { %v2474_v35 = vpop.permute.xlu1 %2473 }
0x1887   :  { %v2476_v33 = vadd.f32 %v2474_v35, %v2466_v32 }
0x1889   :  { %4129 = vtanh.f32 %v2476_v33 }
0x188a   :  { %v2519_v34 = vpop.permute.xlu1 %2518 }
0x188b   :  { %3767 = vmatprep.mubr.msk.f32.mxu1 %vm273_vm2, %v2519_v34  ;;  %v2895_v34 = vld [vmem:[%s5102_s10] sm:$0xf] }
0x188c   :  { %3781 = vmatprep.subr.msk.mxu1 %vm2498_vm4, %v2895_v34 }
0x1893   :  { %v4130_v41 = vpop.eup %4129 }
0x1894   :  { %2479 = vrot.lane.b32.xlu0 %v4130_v41, %s4396_s0 }
0x1906   :  { %v2480_v58 = vpop.permute.xlu0 %2479 }
0x1907   :  { %v2482_v38 = vmul.f32 %v4128_v28, %v2480_v58 }
0x1909   :  { %v2494_v47 = vrot.slane %v2482_v38, 2 }
0x190b   :  { %v2504_v42 = vsel %vm2500_vm5, %v2503_v30, %v2494_v47 }
0x190c   :  { %2520 = vrot.lane.b32.xlu0 %v2504_v42, %s4397_s23 }
0x197e   :  { %v2521_v45 = vpop.permute.xlu0 %2520 }
0x197f   :  { %3768 = vmatmul.mubr.msk.f32.vlgmr.msra.gmra.mrb[24].mxu1 %vm273_vm2, %v2521_v45 }
0x1980   :  { %3782 = vmatpush3.msk.msra.mxu1 %vm2498_vm4, %v2895_v34 }
0x1981   :  { %3978 = vmatprep.subr.bf16.mxu1 %v4393_v0 }
0x1a52   :  { %v3769_v50 = vpop.f32.mrb[24].mxu1 }
0x1a53   :  { %v2598_v51 = vadd.f32 %v3769_v50, %v3327_v48  ;;  %v2592_v52 = vpop.f32.mrb[25].mxu1 }
0x1a54   :  { %v2593_v53 = vadd.f32 %v3327_v48, %v2592_v52 }
0x1a55   :  { %v2620_v56 = vcombine.high %v2598_v51, %v2598_v51  ;;  %v2627_v5 = vrot.slane %v2598_v51, %v4977_v55 }
0x1a56   :  { %v2603_v4 = vcombine.high %v2593_v53, %v2593_v53  ;;  %v2610_v6 = vrot.slane %v2593_v53, %v4977_v55 }
0x1a57   :  { %v2634_v57 = vrot.slane %v2620_v56, %v4977_v55  ;;  %v2635_v9 = vcombine.high %v2627_v5, %v2627_v5 }
0x1a58   :  { %v2617_v7 = vrot.slane %v2603_v4, %v4977_v55  ;;  %v2618_v10 = vcombine.high %v2610_v6, %v2610_v6 }
0x1a59   :  { %v2636_v12 = vcombine.high %v2634_v57, %v2634_v57 }
0x1a5a   :  { %v2619_v11 = vcombine.high %v2617_v7, %v2617_v7 }
0x1a5b   :  { %v2645_v59 = vmul.f32 0.35355338, %v2636_v12 }
0x1a5d   :  { %2647 = vrot.lane.b32.xlu1 %v2645_v59, %s4397_s23 }
0x1acf   :  { %v2648_v30 = vpop.permute.xlu1 %2647 }
0x1ad0   :  { %v2654_v13 = vmul.f32 %v2648_v30, %v2627_v5  ;;  %v2655_v14 = vmul.f32 %v2648_v30, %v2635_v9  ;;  %v2656_v16 = vmul.f32 %v2648_v30, %v2634_v57  ;;  %v2657_v18 = vmul.f32 %v2648_v30, %v2636_v12 }
0x1ad1   :  { %v2650_v19 = vmul.f32 %v2648_v30, %v2610_v6  ;;  %v2651_v20 = vmul.f32 %v2648_v30, %v2618_v10  ;;  %v2652_v21 = vmul.f32 %v2648_v30, %v2617_v7  ;;  %v2653_v22 = vmul.f32 %v2648_v30, %v2619_v11 }
0x1ad2   :  { %v2687_v23 = vcombine.low %v2654_v13, %v2655_v14  ;;  %v2688_v24 = vcombine.low %v2656_v16, %v2657_v18 }
0x1ad3   :  { %v2670_v44 = vcombine.low %v2650_v19, %v2651_v20  ;;  %v2671_v25 = vcombine.low %v2652_v21, %v2653_v22 }
0x1ad4   :  { %v2695_v26 = vrot.slane %v2687_v23, %v4977_v55  ;;  %v2702_v27 = vrot.slane %v2688_v24, %v4977_v55 }
0x1ad5   :  { %v2678_v28 = vrot.slane %v2670_v44, %v4977_v55  ;;  %v2685_v29 = vrot.slane %v2671_v25, %v4977_v55 }
0x1ad6   :  { %v2703_v31 = vcombine.low %v2695_v26, %v2702_v27 }
0x1ad7   :  { %v2686_v32 = vcombine.low %v2678_v28, %v2685_v29 }
0x1ad8   :  { %2706 = vrot.lane.b32.xlu1 %v2703_v31, %s4399_s1 }
0x1ad9   :  { %2704 = vrot.lane.b32.xlu0 %v2686_v32, %s4399_s1 }
0x1adc   :  { %3067 = vrot.lane.b32.xlu1 %v2618_v10, %s4396_s0 }
0x1add   :  { %3065 = vrot.lane.b32.xlu0 %v2610_v6, %s4396_s0 }
0x1ae0   :  { %3071 = vrot.lane.b32.xlu1 %v2619_v11, %s4396_s0 }
0x1ae1   :  { %3069 = vrot.lane.b32.xlu0 %v2617_v7, %s4396_s0 }
0x1ae4   :  { %3075 = vrot.lane.b32.xlu1 %v2635_v9, %s4396_s0 }
0x1ae5   :  { %3073 = vrot.lane.b32.xlu0 %v2627_v5, %s4396_s0 }
0x1ae8   :  { %3079 = vrot.lane.b32.xlu1 %v2636_v12, %s4396_s0 }
0x1ae9   :  { %3077 = vrot.lane.b32.xlu0 %v2634_v57, %s4396_s0 }
0x1b4a   :  { %v2707_v35 = vpop.permute.xlu1 %2706 }
0x1b4b   :  { %v2705_v33 = vpop.permute.xlu0 %2704 }
0x1b4c   :  { %3778 = vmatprep.mubr.msk.f32.mxu0 %vm273_vm2, %v2705_v33 }
0x1b4d   :  { %3779 = vmatmul.mubr.msk.f32.vlgmr.msra.gmra.mrb[26].mxu0 %vm273_vm2, %v2707_v35 }
0x1b4e   :  { %3794 = vmatprep.mubr.msk.f32.mxu0 %vm4394_vm0, %v4395_v1 }
0x1c20   :  { %v3780_v36 = vpop.f32.mrb[26].mxu0 }
0x1c21   :  { %v2806_v37 = vcombine.high %v3780_v36, %v3780_v36  ;;  %v2813_v39 = vrot.slane %v3780_v36, %v4977_v55  ;;  %v2778_v17 = vpop.f32.mrb[27].mxu0 }
0x1c22   :  { %v2789_v43 = vcombine.high %v2778_v17, %v2778_v17  ;;  %v2796_v40 = vrot.slane %v2778_v17, %v4977_v55 }
0x1c23   :  { %v2820_v41 = vrot.slane %v2806_v37, %v4977_v55  ;;  %v2821_v58 = vcombine.high %v2813_v39, %v2813_v39  ;;  %v2836_v38 = vsel %vm2831_vm6, %v2813_v39, -inf }
0x1c24   :  { %v2803_v47 = vrot.slane %v2789_v43, %v4977_v55  ;;  %v2804_v42 = vcombine.high %v2796_v40, %v2796_v40  ;;  %v2832_v45 = vsel %vm2831_vm6, %v2796_v40, -inf }
0x1c25   :  { %v2822_v15 = vcombine.high %v2820_v41, %v2820_v41  ;;  %v2838_v46 = vsel %vm2831_vm6, %v2821_v58, -inf  ;;  %v2840_v8 = vsel %vm2831_vm6, %v2820_v41, -inf  ;;  %v2837_v48 = vmax.f32 %v2832_v45, %v2836_v38 }
0x1c26   :  { %v2805_v49 = vcombine.high %v2803_v47, %v2803_v47  ;;  %v2833_v54 = vsel %vm2831_vm6, %v2804_v42, -inf  ;;  %v2834_v50 = vsel %vm2831_vm6, %v2803_v47, -inf }
0x1c27   :  { %v2842_v51 = vsel %vm2831_vm6, %v2822_v15, -inf  ;;  %v2839_v52 = vmax.f32 %v2833_v54, %v2838_v46  ;;  %v2841_v53 = vmax.f32 %v2834_v50, %v2840_v8 }
0x1c28   :  { %v2835_v56 = vsel %vm2831_vm6, %v2805_v49, -inf }
0x1c29   :  { %v2843_v57 = vmax.f32 %v2835_v56, %v2842_v51  ;;  %v2844_v12 = vmax.f32 %v2837_v48, %v2839_v52 }
0x1c2b   :  { %v2845_v59 = vmax.f32 %v2841_v53, %v2843_v57 }
0x1c2d   :  { %v2846_v60 = vmax.f32 %v2844_v12, %v2845_v59  ;;  %v3113_v12 = vld [vmem:[%s5103_s11] sm:$0xff]  ;;  %v3114_v59 = vld [vmem:[%s5103_s11 + $0x8] sm:$0xff] }
0x1c2f   :  { %v2847_v61 = vsub.f32 %v2796_v40, %v2846_v60  ;;  %v2848_v62 = vsub.f32 %v2804_v42, %v2846_v60  ;;  %v2849_v63 = vsub.f32 %v2803_v47, %v2846_v60  ;;  %v2850_v2 = vsub.f32 %v2805_v49, %v2846_v60 }
0x1c30   :  { %v2851_v3 = vsub.f32 %v2813_v39, %v2846_v60  ;;  %v2852_v4 = vsub.f32 %v2821_v58, %v2846_v60  ;;  %v2853_v5 = vsub.f32 %v2820_v41, %v2846_v60  ;;  %v2854_v6 = vsub.f32 %v2822_v15, %v2846_v60  ;;  %v3115_v60 = vld [vmem:[%s5103_s11 + $0x10] sm:$0xff] }
0x1c31   :  { %v2855_v7 = vmul.f32 1.442695, %v2847_v61  ;;  %v2857_v9 = vmul.f32 1.442695, %v2848_v62  ;;  %v2859_v10 = vmul.f32 1.442695, %v2849_v63  ;;  %v3973_v61 = vpack.c.bf16 %v3114_v59, %v3113_v12 }
0x1c32   :  { %v2861_v11 = vmul.f32 1.442695, %v2850_v2  ;;  %v2863_v30 = vmul.f32 1.442695, %v2851_v3  ;;  %v2865_v13 = vmul.f32 1.442695, %v2852_v4  ;;  %v3066_v4 = vpop.permute.xlu0 %3065 }
0x1c33   :  { %4131 = vpow2.f32 %v2855_v7  ;;  %v2867_v14 = vmul.f32 1.442695, %v2853_v5  ;;  %v2869_v16 = vmul.f32 1.442695, %v2854_v6  ;;  %v3116_v62 = vld [vmem:[%s5103_s11 + $0x18] sm:$0xff]  ;;  %3974 = vmatpush3.bf16.msra.mxu0 %v3973_v61  ;;  %v3198_v2 = vld [vmem:[%s5105_s13 + $0x8] sm:$0xff]  ;;  %v3068_v5 = vpop.permute.xlu1 %3067 }
0x1c34   :  { %4133 = vpow2.f32 %v2857_v9  ;;  %v3976_v63 = vpack.c.bf16 %v3116_v62, %v3115_v60  ;;  %3975 = vmatprep.subr.bf16.mxu0 %v4393_v0 }
0x1c35   :  { %4135 = vpow2.f32 %v2859_v10 }
0x1c36   :  { %4137 = vpow2.f32 %v2861_v11  ;;  %v3070_v7 = vpop.permute.xlu0 %3069 }
0x1c37   :  { %4139 = vpow2.f32 %v2863_v30  ;;  %3977 = vmatpush3.bf16.msra.mxu0 %v3976_v63  ;;  %v3072_v30 = vpop.permute.xlu1 %3071 }
0x1c38   :  { %4141 = vpow2.f32 %v2865_v13 }
0x1c39   :  { %4143 = vpow2.f32 %v2867_v14 }
0x1c3a   :  { %4145 = vpow2.f32 %v2869_v16 }
0x1c3d   :  { %v4132_v18 = vpop.eup %4131 }
0x1c3e   :  { %v4134_v19 = vpop.eup %4133  ;;  %v2871_v20 = vsel %vm2831_vm6, %v4132_v18, 0.0 }
0x1c3f   :  { %v4136_v21 = vpop.eup %4135  ;;  %v2872_v22 = vsel %vm2831_vm6, %v4134_v19, 0.0 }
0x1c40   :  { %v4138_v23 = vpop.eup %4137  ;;  %v2873_v24 = vadd.f32 %v2872_v22, %v2871_v20  ;;  %v2874_v44 = vsel %vm2831_vm6, %v4136_v21, 0.0  ;;  %v3074_v22 = vpop.permute.xlu0 %3073 }
0x1c41   :  { %v4140_v25 = vpop.eup %4139  ;;  %v2876_v27 = vsel %vm2831_vm6, %v4138_v23, 0.0 }
0x1c42   :  { %v2875_v26 = vadd.f32 %v2874_v44, %v2873_v24  ;;  %v4142_v28 = vpop.eup %4141  ;;  %v2878_v31 = vsel %vm2831_vm6, %v4140_v25, 0.0 }
0x1c43   :  { %v4144_v32 = vpop.eup %4143  ;;  %v2880_v33 = vsel %vm2831_vm6, %v4142_v28, 0.0 }
0x1c44   :  { %v2877_v29 = vadd.f32 %v2876_v27, %v2875_v26  ;;  %v4146_v34 = vpop.eup %4145  ;;  %v2882_v37 = vsel %vm2831_vm6, %v4144_v32, 0.0  ;;  %v3076_v27 = vpop.permute.xlu1 %3075 }
0x1c45   :  { %v2884_v17 = vsel %vm2831_vm6, %v4146_v34, 0.0 }
0x1c46   :  { %v2879_v35 = vadd.f32 %v2878_v31, %v2877_v29 }
0x1c48   :  { %v2881_v36 = vadd.f32 %v2880_v33, %v2879_v35 }
0x1c4a   :  { %v2883_v39 = vadd.f32 %v2882_v37, %v2881_v36  ;;  %v3078_v36 = vpop.permute.xlu0 %3077 }
0x1c4c   :  { %v2885_v43 = vadd.f32 %v2884_v17, %v2883_v39  ;;  %v3080_v17 = vpop.permute.xlu1 %3079 }
0x1c4e   :  { %4147 = vrcp.f32 %v2885_v43 }
0x1c58   :  { %v4148_v40 = vpop.eup %4147 }
0x1c59   :  { %v2887_v41 = vmul.f32 %v4148_v40, %v4132_v18  ;;  %v2888_v58 = vmul.f32 %v4148_v40, %v4134_v19  ;;  %v2889_v38 = vmul.f32 %v4148_v40, %v4136_v21  ;;  %v2890_v47 = vmul.f32 %v4148_v40, %v4138_v23 }
0x1c5a   :  { %v2891_v42 = vmul.f32 %v4148_v40, %v4140_v25  ;;  %v2892_v45 = vmul.f32 %v4148_v40, %v4142_v28  ;;  %v2893_v15 = vmul.f32 %v4148_v40, %v4144_v32  ;;  %v2894_v46 = vmul.f32 %v4148_v40, %v4146_v34 }
0x1c5b   :  { %v2904_v8 = vcombine.low %v2887_v41, %v2888_v58  ;;  %v2905_v48 = vcombine.low %v2889_v38, %v2890_v47 }
0x1c5c   :  { %v2921_v49 = vcombine.low %v2891_v42, %v2892_v45  ;;  %v2922_v54 = vcombine.low %v2893_v15, %v2894_v46  ;;  %v3199_v15 = vld [vmem:[%s5105_s13 + $0x10] sm:$0xff]  ;;  %v3200_v46 = vld [vmem:[%s5105_s13 + $0x18] sm:$0xff] }
0x1c5d   :  { %v2912_v50 = vrot.slane %v2904_v8, %v4977_v55  ;;  %v2919_v51 = vrot.slane %v2905_v48, %v4977_v55  ;;  %v3982_v8 = vpack.c.bf16 %v3200_v46, %v3199_v15  ;;  %v3335_v48 = vld [vmem:[%s5104_s12] ss:$0 sm:$0xff] }
0x1c5e   :  { %v2929_v52 = vrot.slane %v2921_v49, %v4977_v55  ;;  %v2936_v53 = vrot.slane %v2922_v54, %v4977_v55 }
0x1c5f   :  { %v2920_v56 = vcombine.low %v2912_v50, %v2919_v51  ;;  %v3337_v51 = vld [vmem:[%s5106_s14] ss:$0 sm:$0xff] }
0x1c60   :  { %v2937_v57 = vcombine.low %v2929_v52, %v2936_v53 }
0x1c61   :  { %3783 = vmatprep.mubr.msk.f32.mxu1 %vm2938_vm7, %v2920_v56 }
0x1c62   :  { %3784 = vmatmul.mubr.msk.f32.vlgmr.msra.gmra.mrb[26].mxu1 %vm2938_vm7, %v2937_v57 }
0x1c63   :  { %3805 = vmatprep.mubr.msk.f32.mxu1 %vm4394_vm0, %v4395_v1  ;;  %v3197_v1 = vld [vmem:[%s5105_s13] sm:$0xff]  ;;  %s4348_s13 = scalar_lea.vmem %s3289_s22, 32 }
0x1c64   :  { %v3979_v3 = vpack.c.bf16 %v3198_v2, %v3197_v1  ;;  %p4349_p2 = scmp.ne.s32.totalorder %s3289_s22, %s4348_s13  ;;  %p4354_p4 = scmp.lt.s32.totalorder %s4348_s13, %s4348_s13 }
0x1c66   :  { %3980 = vmatpush3.bf16.msra.mxu1 %v3979_v3  ;;  %p4355_p5 = por %p4354_p4, %p4353_p3 }
0x1c67   :  { %3981 = vmatprep.subr.bf16.mxu1 %v4393_v0 }
0x1c68   :  { %p4356_p6 = pnand %p4355_p5, %p4349_p2 }
0x1c6a   :  { %3983 = vmatpush3.bf16.msra.mxu1 %v3982_v8 }
0x1d35   :  { %v3785_v6 = vpop.f32.mrb[26].mxu1 }
0x1d36   :  { %v3012_v9 = vpop.f32.mrb[27].mxu1  ;;  %v3040_v13 = vcombine.high %v3785_v6, %v3785_v6  ;;  %v3047_v14 = vrot.slane %v3785_v6, %v4977_v55 }
0x1d37   :  { %v3023_v10 = vcombine.high %v3012_v9, %v3012_v9  ;;  %v3030_v11 = vrot.slane %v3012_v9, %v4977_v55 }
0x1d38   :  { %v3054_v23 = vrot.slane %v3040_v13, %v4977_v55  ;;  %v3055_v24 = vcombine.high %v3047_v14, %v3047_v14  ;;  %v3093_v29 = vmul.f32 %v3074_v22, %v3047_v14 }
0x1d39   :  { %v3037_v16 = vrot.slane %v3023_v10, %v4977_v55  ;;  %v3038_v18 = vcombine.high %v3030_v11, %v3030_v11  ;;  %v3089_v19 = vmul.f32 %v3066_v4, %v3030_v11 }
0x1d3a   :  { %v3056_v35 = vcombine.high %v3054_v23, %v3054_v23  ;;  %v3094_v33 = vmul.f32 %v3076_v27, %v3055_v24  ;;  %v3095_v39 = vmul.f32 %v3078_v36, %v3054_v23  ;;  %v3105_v55 = vsel %vm3097_vm8, %v3093_v29, 0.0 }
0x1d3b   :  { %v3039_v20 = vcombine.high %v3037_v16, %v3037_v16  ;;  %v3090_v21 = vmul.f32 %v3068_v5, %v3038_v18  ;;  %v3091_v0 = vmul.f32 %v3070_v7, %v3037_v16  ;;  %v3098_v25 = vsel %vm3097_vm8, %v3089_v19, 0.0 }
0x1d3c   :  { %v3096_v40 = vmul.f32 %v3080_v17, %v3056_v35  ;;  %v3107_v41 = vsel %vm3097_vm8, %v3094_v33, 0.0  ;;  %v3109_v38 = vsel %vm3097_vm8, %v3095_v39, 0.0 }
0x1d3d   :  { %v3092_v44 = vmul.f32 %v3072_v30, %v3039_v20  ;;  %v3099_v26 = vsel %vm3097_vm8, %v3090_v21, 0.0  ;;  %v3101_v31 = vsel %vm3097_vm8, %v3091_v0, 0.0 }
0x1d3e   :  { %v3100_v28 = vadd.f32 %v3099_v26, %v3098_v25  ;;  %v3111_v42 = vsel %vm3097_vm8, %v3096_v40, 0.0 }
0x1d3f   :  { %v3103_v34 = vsel %vm3097_vm8, %v3092_v44, 0.0 }
0x1d40   :  { %v3102_v32 = vadd.f32 %v3101_v31, %v3100_v28 }
0x1d42   :  { %v3104_v37 = vadd.f32 %v3103_v34, %v3102_v32 }
0x1d44   :  { %v3106_v43 = vadd.f32 %v3105_v55, %v3104_v37 }
0x1d46   :  { %v3108_v58 = vadd.f32 %v3107_v41, %v3106_v43 }
0x1d48   :  { %v3110_v47 = vadd.f32 %v3109_v38, %v3108_v58 }
0x1d4a   :  { %v3112_v45 = vadd.f32 %v3111_v42, %v3110_v47 }
0x1d4c   :  { %3795 = vmatmul.mubr.msk.f32.vlgmr.msra.gmra.mrb[28].mxu0 %vm273_vm2, %v3112_v45 }
0x1e1f   :  { %v3193_v49 = vpop.f32.mrb[28].mxu0 }
0x1e20   :  { %v3194_v54 = vadd.f32 %v3335_v48, %v3193_v49  ;;  %v3796_v50 = vpop.f32.mrb[29].mxu0 }
0x1e22   :  { %3806 = vmatmul.mubr.msk.f32.vlgmr.msra.gmra.mrb[28].mxu1 %vm273_vm2, %v3194_v54 }
0x1ef5   :  { %v3277_v52 = vpop.f32.mrb[28].mxu1 }
0x1ef6   :  { %v3278_v53 = vadd.f32 %v3337_v51, %v3277_v52  ;;  %v3807_v56 = vpop.f32.mrb[29].mxu1 }
0x1ef8   :  { %3281 = vst.msk [vmem:[#allocation17] sm:$0x3] %vm2831_vm6, %v3278_v53 }
0x1ef9   :  { %4359 = shalt.err (!%p4356_p6)
}
0x1efa   :  { %s4360_s23 = scalar_lea.hbm %s5107_s15, 32 }
0x1efb   :  { %p4361_p7 = scmp.ne.s32.totalorder %s5107_s15, %s4360_s23  ;;  %p4364_p8 = scmp.lt.u32.totalorder %s4360_s23, %s5107_s15 }
0x1efd   :  { %p4366_p9 = pnand %p4364_p8, %p4361_p7 }
0x1eff   :  { %4369 = shalt.err (!%p4366_p9)
}
0x1f00   :  { %3291 = dma.vmem_to_hbm [thread:$0]  %s3289_s22, 32, %s5107_s15, [#allocation4]  }
0x1f01   :  { %4380 = dma.done.wait [#allocation4], 32  }
0x1f02   :  { %4381 = vsyncadd [#allocation4], 4294967264 }
0x1f03   :  { %3295 = vsyncpa [#allocation3], 1 }
0x1f04   :  { %3296 = vsyncpa [#allocation6], 1 }
0x1f05   :  { %3297 = vsyncpa [#allocation9], 1 }
0x1f06   :  { %3298 = vsyncpa [#allocation12], 1 }
0x1f07   :  { %3299 = vsyncpa [#allocation15], 1 }
0x1f08   :  { %3300 = vsyncpa [#allocation4], 1 }

</bundles_post_ra>
